<compile_context>
chip_gen: v5e
topology: v5e:2x2
jax: 0.10.0
libtpu: 0.0.40
codegen_flags: <defaults>
</compile_context>

<pallas_src>
import jax
import jax.numpy as jnp
from jax.experimental import pallas as pl
from jax.experimental.pallas import tpu as pltpu

BN_EPS = 1e-5
W_SUBLANE = 16                      # width padding (sublane axis); keeps f32 & bf16 reshapes no-ops
POOL_SLAB_LANES = 512               # 4 x 128-aligned pooled segments
EXIT_CH = [16, 64, 64, 128]
EXIT_LANE_OFF = [0, 128, 256, 384]

LAYER_CFG = [                        # H-only convs: kernel (kh,1), stride (sh,1), padding (ph,0)
    dict(cin=1,   cout=16,  kh=6, sh=3, ph=1),   # c1_1
    dict(cin=16,  cout=16,  kh=3, sh=1, ph=1),   # c1_2 -> exit 1
    dict(cin=16,  cout=64,  kh=6, sh=3, ph=1),   # c2   -> exit 2
    dict(cin=64,  cout=64,  kh=3, sh=1, ph=1),   # c3   -> exit 3
    dict(cin=64,  cout=128, kh=6, sh=3, ph=1),   # c4   -> exit 4
]


def _round_up(x, m):
    return ((x + m - 1) // m) * m


def _conv_hout(hin, kh, sh, ph):
    return (hin + 2 * ph - kh) // sh + 1


def _layer_heights(H):
    hs, h = [], H
    for cfg in LAYER_CFG:
        h = _conv_hout(h, cfg['kh'], cfg['sh'], cfg['ph'])
        hs.append(h)
    return hs


# ----------------------- in-kernel conv + BN + ReLU -----------------------

def _conv_bn_relu(x3, w_ref, shift_ref, *, kh, sh, ph, hin, hout, wp):
    """Conv2d((kh,1),(sh,1),(ph,0)) + folded BN + ReLU on a VMEM-resident value.

    x3:        f32 value (hin, wp, cin)   -- H outer, W sublanes, C lanes
    w_ref:     bf16 ref  (kh, cin, cout)  -- per-tap weights, BN scale folded in
    shift_ref: f32 ref   (1, cout)        -- conv bias + BN shift
    returns:   f32 value (hout, wp, cout)
    """
    cin = x3.shape[-1]
    cout = w_ref.shape[-1]
    hpad = hin + 2 * ph
    hbuf = hpad if sh == 1 else _round_up(hpad, sh)
    xp = jnp.concatenate(
        [jnp.zeros((ph, wp, cin), jnp.bfloat16),
         x3.astype(jnp.bfloat16),
         jnp.zeros((hbuf - hin - ph, wp, cin), jnp.bfloat16)], axis=0)

    acc = jnp.zeros((hout * wp, cout), jnp.float32)
    if sh == 1:
        for j in range(kh):
            slab = xp[j:j + hout].reshape(hout * wp, cin)
            acc = acc + jnp.dot(slab, w_ref[j], preferred_element_type=jnp.float32)
    else:
        # phase view: xp[h] == xph[h // sh, h % sh]  (pure outer-dim relabel, free)
        xph = xp.reshape(hbuf // sh, sh, wp, cin)
        for j in range(kh):
            p, q = j % sh, j // sh
            slab = xph[q:q + hout, p].reshape(hout * wp, cin)
            acc = acc + jnp.dot(slab, w_ref[j], preferred_element_type=jnp.float32)

    y = jnp.maximum(acc + shift_ref[...], 0.0)          # f32 epilogue (v5e-safe)
    return y.reshape(hout, wp, cout)


def _make_kernel(hs, wp):
    def kernel(*refs):
        x_ref, o_ref = refs[0], refs[-1]
        wrefs, srefs = refs[1:-1:2], refs[2:-1:2]

        # layer 0 (c1_1): Cin == 1, taps were pre-gathered -> one matmul
        cfg0 = LAYER_CFG[0]
        p = x_ref[0].reshape(hs[0] * wp, cfg0['kh'])                        # bf16
        a = jnp.dot(p, wrefs[0][...], preferred_element_type=jnp.float32)
        y = jnp.maximum(a + srefs[0][...], 0.0).reshape(hs[0], wp, cfg0['cout'])

        # layers 1..4 (c1_2, c2, c3, c4) + fused exit pooling (sum over H)
        for li in range(1, len(LAYER_CFG)):
            cfg = LAYER_CFG[li]
            y = _conv_bn_relu(y, wrefs[li], srefs[li],
                              kh=cfg['kh'], sh=cfg['sh'], ph=cfg['ph'],
                              hin=hs[li - 1], hout=hs[li], wp=wp)
            off = EXIT_LANE_OFF[li - 1]
            o_ref[0, :, off:off + cfg['cout']] = jnp.sum(y, axis=0)         # (wp, cout)

    return kernel


# ----------------------- parameters -----------------------

def init_params(key, H, W, category):
    hs = _layer_heights(H)
    params = dict(layers=[], exits=[], ens_w=[], ens_b=[])
    for cfg in LAYER_CFG:
        key, k1, k2 = jax.random.split(key, 3)
        cout, cin, kh = cfg['cout'], cfg['cin'], cfg['kh']
        w_pt = jax.random.normal(k1, (cout, cin, kh, 1), jnp.float32) * 0.1   # Conv2d weight (OIHW)
        b_conv = jax.random.normal(k2, (cout,), jnp.float32) * 0.1            # Conv2d bias
        gamma = jnp.ones((cout,), jnp.float32)                                # BatchNorm defaults
        beta = jnp.zeros((cout,), jnp.float32)
        run_mean = jnp.zeros((cout,), jnp.float32)
        run_var = jnp.ones((cout,), jnp.float32)
        scale = gamma / jnp.sqrt(run_var + BN_EPS)                            # eval-mode BN fold
        shift = beta + (b_conv - run_mean) * scale
        # per-tap matmul weights, BN scale folded:  w_taps[j, ci, co] = w_pt[co, ci, j, 0]*scale[co]
        w_taps = w_pt[:, :, :, 0].transpose(2, 1, 0) * scale[None, None, :]
        if cin == 1:
            w_taps = w_taps[:, 0, :]                                          # (kh, cout) for c1_1
        params['layers'].append(dict(w=w_taps.astype(jnp.bfloat16),
                                     shift=shift.reshape(1, cout)))
    for c_feat, h_e in zip(EXIT_CH, hs[1:]):
        key, k1, k2 = jax.random.split(key, 3)
        F = c_feat * W
        w_lin = jax.random.normal(k1, (category, F), jnp.float32) * 0.05      # nn.Linear weight
        b_lin = jax.random.normal(k2, (category,), jnp.float32) * 0.05
        params['exits'].append(dict(w_eff=w_lin.T / float(h_e),               # 1/Hout folded in
                                    b=b_lin.reshape(1, category)))
    for _ in range(9):
        key, k1 = jax.random.split(key)
        params['ens_w'].append(jax.random.normal(k1, (1, category), jnp.float32))
        params['ens_b'].append(jnp.zeros((1, category), jnp.float32))
    return params


# ----------------------- forward -----------------------

def net_ee_forward(x_nchw, params):
    """if_train=True path of Net_EE.forward; returns list of 4 (N, category) logits."""
    N, _, H, W = x_nchw.shape
    wp = _round_up(max(W, 1), W_SUBLANE)
    hs = _layer_heights(H)
    kernel = _make_kernel(hs, wp)

    # layer-1 (c1_1) im2col on the tiny raw input (Cin=1, kernel width 1)
    cfg0 = LAYER_CFG[0]
    x = jnp.pad(x_nchw[:, 0], ((0, 0), (cfg0['ph'], cfg0['ph']), (0, wp - W)))
    idx = jnp.arange(hs[0])[:, None] * cfg0['sh'] + jnp.arange(cfg0['kh'])[None, :]
    patches = x[:, idx, :].transpose(0, 1, 3, 2).astype(jnp.bfloat16)          # (N, H1, wp, kh)

    def _const_map(nd):
        return lambda n: (0,) * nd

    inputs = [patches]
    in_specs = [pl.BlockSpec((1, hs[0], wp, cfg0['kh']), lambda n: (n, 0, 0, 0))]
    for lp in params['layers']:
        inputs += [lp['w'], lp['shift']]
        in_specs += [pl.BlockSpec(lp['w'].shape, _const_map(lp['w'].ndim)),
                     pl.BlockSpec(lp['shift'].shape, _const_map(2))]

    pooled = pl.pallas_call(
        kernel,
        out_shape=jax.ShapeDtypeStruct((N, wp, POOL_SLAB_LANES), jnp.float32),
        grid=(N,),
        in_specs=in_specs,
        out_specs=pl.BlockSpec((1, wp, POOL_SLAB_LANES), lambda n: (n, 0, 0)),
        compiler_params=pltpu.CompilerParams(dimension_semantics=("parallel",)),
    )(*inputs)

    # tiny exit Linears + 'normal' ensembles in plain jnp (fused in the same jit)
    raw = []
    for e in range(4):
        C = EXIT_CH[e]
        pe = pooled[:, :W, EXIT_LANE_OFF[e]:EXIT_LANE_OFF[e] + C]   # (N, W, C): sum over H
        feat = pe.transpose(0, 2, 1).reshape(N, C * W)              # PyTorch Flatten order c*W + w
        ep = params['exits'][e]
        raw.append(feat @ ep['w_eff'] + ep['b'])                    # mean folded into w_eff

    ew, eb = params['ens_w'], params['ens_b']
    ens = lambda i, v: v * ew[i] + eb[i]                            # ensemble_mode='normal'
    out0 = raw[0]
    out1 = ens(0, out0) + ens(1, raw[1])
    out2 = ens(2, out0) + ens(3, out1) + ens(4, raw[2])
    out3 = ens(5, out0) + ens(6, out1) + ens(7, out2) + ens(8, raw[3])
    return [out0, out1, out2, out3]


if __name__ == "__main__":
    key = jax.random.PRNGKey(0)
    N, H, W, category = 2, 64, 9, 6            # x: (N, 1, H, W), train_shape[-1] = W
    kx, kp = jax.random.split(key)
    x = jax.random.normal(kx, (N, 1, H, W), jnp.float32)
    params = init_params(kp, H, W, category)

    fwd = jax.jit(net_ee_forward)
    outs = fwd(x, params)
    outs = [jax.block_until_ready(o) for o in outs]

    assert len(outs) == 4
    for o in outs:
        assert o.shape == (N, category) and o.dtype == jnp.float32
        assert bool(jnp.all(jnp.isfinite(o)))
    print("KERNEL_OK")
</pallas_src>

<mosaic_0001>
module attributes {stable_mosaic.version = 11 : i64} {
  func.func @kernel(%arg0: i32, %arg1: memref<1x21x16x6xbf16, #tpu.memory_space<vmem>>, %arg2: memref<6x16xbf16, #tpu.memory_space<vmem>>, %arg3: memref<1x16xf32, #tpu.memory_space<vmem>>, %arg4: memref<3x16x16xbf16, #tpu.memory_space<vmem>>, %arg5: memref<1x16xf32, #tpu.memory_space<vmem>>, %arg6: memref<6x16x64xbf16, #tpu.memory_space<vmem>>, %arg7: memref<1x64xf32, #tpu.memory_space<vmem>>, %arg8: memref<3x64x64xbf16, #tpu.memory_space<vmem>>, %arg9: memref<1x64xf32, #tpu.memory_space<vmem>>, %arg10: memref<6x64x128xbf16, #tpu.memory_space<vmem>>, %arg11: memref<1x128xf32, #tpu.memory_space<vmem>>, %arg12: memref<1x16x512xf32, #tpu.memory_space<vmem>>) attributes {dimension_semantics = [#tpu.dimension_semantics<parallel>], iteration_bounds = array<i64: 2>, scalar_prefetch = 0 : i64, scratch_operands = 0 : i64, tpu.core_type = #tpu.core_type<tc>, window_params = [{transform_indices = @transform_0, window_bounds = array<i64: 1, 21, 16, 6>}, {pipeline_mode = #tpu.pipeline_mode<synchronous>, transform_indices = @transform_1, window_bounds = array<i64: 6, 16>}, {pipeline_mode = #tpu.pipeline_mode<synchronous>, transform_indices = @transform_2, window_bounds = array<i64: 1, 16>}, {pipeline_mode = #tpu.pipeline_mode<synchronous>, transform_indices = @transform_3, window_bounds = array<i64: 3, 16, 16>}, {pipeline_mode = #tpu.pipeline_mode<synchronous>, transform_indices = @transform_4, window_bounds = array<i64: 1, 16>}, {pipeline_mode = #tpu.pipeline_mode<synchronous>, transform_indices = @transform_5, window_bounds = array<i64: 6, 16, 64>}, {pipeline_mode = #tpu.pipeline_mode<synchronous>, transform_indices = @transform_6, window_bounds = array<i64: 1, 64>}, {pipeline_mode = #tpu.pipeline_mode<synchronous>, transform_indices = @transform_7, window_bounds = array<i64: 3, 64, 64>}, {pipeline_mode = #tpu.pipeline_mode<synchronous>, transform_indices = @transform_8, window_bounds = array<i64: 1, 64>}, {pipeline_mode = #tpu.pipeline_mode<synchronous>, transform_indices = @transform_9, window_bounds = array<i64: 6, 64, 128>}, {pipeline_mode = #tpu.pipeline_mode<synchronous>, transform_indices = @transform_10, window_bounds = array<i64: 1, 128>}, {transform_indices = @transform_11, window_bounds = array<i64: 1, 16, 512>}]} {
    %c0 = arith.constant 0 : index
    %c0_0 = arith.constant 0 : index
    %c0_1 = arith.constant 0 : index
    %c0_2 = arith.constant 0 : index
    %0 = vector.load %arg1[%c0, %c0_0, %c0_1, %c0_2] : memref<1x21x16x6xbf16, #tpu.memory_space<vmem>>, vector<1x21x16x6xbf16>
    %1 = vector.shape_cast %0 : vector<1x21x16x6xbf16> to vector<21x16x6xbf16>
    %2 = vector.shape_cast %1 : vector<21x16x6xbf16> to vector<336x6xbf16>
    %c0_3 = arith.constant 0 : index
    %c0_4 = arith.constant 0 : index
    %3 = vector.load %arg2[%c0_3, %c0_4] : memref<6x16xbf16, #tpu.memory_space<vmem>>, vector<6x16xbf16>
    %cst = arith.constant dense<0.000000e+00> : vector<336x16xf32>
    %4 = tpu.matmul %2, %3, %cst {dimension_numbers = #tpu.dot_dimension_numbers<[1], [0], [0], [1], [0, 0, 1, 1], [], []>} : vector<336x6xbf16>, vector<6x16xbf16>, vector<336x16xf32> -> vector<336x16xf32>
    %c0_5 = arith.constant 0 : index
    %c0_6 = arith.constant 0 : index
    %5 = vector.load %arg3[%c0_5, %c0_6] : memref<1x16xf32, #tpu.memory_space<vmem>>, vector<1x16xf32>
    %6 = vector.broadcast %5 : vector<1x16xf32> to vector<336x16xf32>
    %7 = arith.addf %4, %6 : vector<336x16xf32>
    %cst_7 = arith.constant 0.000000e+00 : f32
    %8 = vector.broadcast %cst_7 : f32 to vector<336x16xf32>
    %9 = arith.maximumf %7, %8 : vector<336x16xf32>
    %10 = vector.shape_cast %9 : vector<336x16xf32> to vector<21x16x16xf32>
    %cst_8 = arith.constant 0.000000e+00 : bf16
    %11 = vector.broadcast %cst_8 : bf16 to vector<1x16x16xbf16>
    %12 = arith.truncf %10 : vector<21x16x16xf32> to vector<21x16x16xbf16>
    %cst_9 = arith.constant 0.000000e+00 : bf16
    %13 = vector.broadcast %cst_9 : bf16 to vector<1x16x16xbf16>
    %14 = tpu.concatenate %11, %12, %13 in 0 : vector<1x16x16xbf16>, vector<21x16x16xbf16>, vector<1x16x16xbf16> -> vector<23x16x16xbf16>
    %cst_10 = arith.constant 0.000000e+00 : f32
    %15 = vector.broadcast %cst_10 : f32 to vector<336x16xf32>
    %16 = vector.extract_strided_slice %14 {offsets = [0, 0, 0], sizes = [21, 16, 16], strides = [1, 1, 1]} : vector<23x16x16xbf16> to vector<21x16x16xbf16>
    %17 = vector.shape_cast %16 : vector<21x16x16xbf16> to vector<336x16xbf16>
    %c0_11 = arith.constant 0 : index
    %c0_12 = arith.constant 0 : index
    %c0_13 = arith.constant 0 : index
    %18 = vector.load %arg4[%c0_11, %c0_12, %c0_13] : memref<3x16x16xbf16, #tpu.memory_space<vmem>>, vector<1x16x16xbf16>
    %19 = vector.shape_cast %18 : vector<1x16x16xbf16> to vector<16x16xbf16>
    %cst_14 = arith.constant dense<0.000000e+00> : vector<336x16xf32>
    %20 = tpu.matmul %17, %19, %cst_14 {dimension_numbers = #tpu.dot_dimension_numbers<[1], [0], [0], [1], [0, 0, 1, 1], [], []>} : vector<336x16xbf16>, vector<16x16xbf16>, vector<336x16xf32> -> vector<336x16xf32>
    %21 = arith.addf %15, %20 : vector<336x16xf32>
    %22 = vector.extract_strided_slice %14 {offsets = [1, 0, 0], sizes = [21, 16, 16], strides = [1, 1, 1]} : vector<23x16x16xbf16> to vector<21x16x16xbf16>
    %23 = vector.shape_cast %22 : vector<21x16x16xbf16> to vector<336x16xbf16>
    %c1 = arith.constant 1 : index
    %c0_15 = arith.constant 0 : index
    %c0_16 = arith.constant 0 : index
    %24 = vector.load %arg4[%c1, %c0_15, %c0_16] : memref<3x16x16xbf16, #tpu.memory_space<vmem>>, vector<1x16x16xbf16>
    %25 = vector.shape_cast %24 : vector<1x16x16xbf16> to vector<16x16xbf16>
    %cst_17 = arith.constant dense<0.000000e+00> : vector<336x16xf32>
    %26 = tpu.matmul %23, %25, %cst_17 {dimension_numbers = #tpu.dot_dimension_numbers<[1], [0], [0], [1], [0, 0, 1, 1], [], []>} : vector<336x16xbf16>, vector<16x16xbf16>, vector<336x16xf32> -> vector<336x16xf32>
    %27 = arith.addf %21, %26 : vector<336x16xf32>
    %28 = vector.extract_strided_slice %14 {offsets = [2, 0, 0], sizes = [21, 16, 16], strides = [1, 1, 1]} : vector<23x16x16xbf16> to vector<21x16x16xbf16>
    %29 = vector.shape_cast %28 : vector<21x16x16xbf16> to vector<336x16xbf16>
    %c2 = arith.constant 2 : index
    %c0_18 = arith.constant 0 : index
    %c0_19 = arith.constant 0 : index
    %30 = vector.load %arg4[%c2, %c0_18, %c0_19] : memref<3x16x16xbf16, #tpu.memory_space<vmem>>, vector<1x16x16xbf16>
    %31 = vector.shape_cast %30 : vector<1x16x16xbf16> to vector<16x16xbf16>
    %cst_20 = arith.constant dense<0.000000e+00> : vector<336x16xf32>
    %32 = tpu.matmul %29, %31, %cst_20 {dimension_numbers = #tpu.dot_dimension_numbers<[1], [0], [0], [1], [0, 0, 1, 1], [], []>} : vector<336x16xbf16>, vector<16x16xbf16>, vector<336x16xf32> -> vector<336x16xf32>
    %33 = arith.addf %27, %32 : vector<336x16xf32>
    %c0_21 = arith.constant 0 : index
    %c0_22 = arith.constant 0 : index
    %34 = vector.load %arg5[%c0_21, %c0_22] : memref<1x16xf32, #tpu.memory_space<vmem>>, vector<1x16xf32>
    %35 = vector.broadcast %34 : vector<1x16xf32> to vector<336x16xf32>
    %36 = arith.addf %33, %35 : vector<336x16xf32>
    %cst_23 = arith.constant 0.000000e+00 : f32
    %37 = vector.broadcast %cst_23 : f32 to vector<336x16xf32>
    %38 = arith.maximumf %36, %37 : vector<336x16xf32>
    %39 = vector.shape_cast %38 : vector<336x16xf32> to vector<21x16x16xf32>
    %cst_24 = arith.constant dense<0.000000e+00> : vector<16x16xf32>
    %40 = vector.multi_reduction <add>, %39, %cst_24 [0] : vector<21x16x16xf32> to vector<16x16xf32>
    %c0_25 = arith.constant 0 : index
    %c0_26 = arith.constant 0 : index
    %c0_27 = arith.constant 0 : index
    %41 = vector.load %arg12[%c0_25, %c0_26, %c0_27] : memref<1x16x512xf32, #tpu.memory_space<vmem>>, vector<1x16x16xf32>
    %42 = vector.shape_cast %41 : vector<1x16x16xf32> to vector<16x16xf32>
    %43 = vector.shape_cast %40 : vector<16x16xf32> to vector<1x16x16xf32>
    tpu.vector_store %arg12[%c0_25, %c0_26, %c0_27], %43 {strides = array<i32>} : memref<1x16x512xf32, #tpu.memory_space<vmem>>, vector<1x16x16xf32>,
    %cst_28 = arith.constant 0.000000e+00 : bf16
    %44 = vector.broadcast %cst_28 : bf16 to vector<1x16x16xbf16>
    %45 = arith.truncf %39 : vector<21x16x16xf32> to vector<21x16x16xbf16>
    %cst_29 = arith.constant 0.000000e+00 : bf16
    %46 = vector.broadcast %cst_29 : bf16 to vector<2x16x16xbf16>
    %47 = tpu.concatenate %44, %45, %46 in 0 : vector<1x16x16xbf16>, vector<21x16x16xbf16>, vector<2x16x16xbf16> -> vector<24x16x16xbf16>
    %cst_30 = arith.constant 0.000000e+00 : f32
    %48 = vector.broadcast %cst_30 : f32 to vector<96x64xf32>
    %49 = vector.shape_cast %47 : vector<24x16x16xbf16> to vector<8x3x16x16xbf16>
    %50 = vector.extract_strided_slice %49 {offsets = [0, 0, 0, 0], sizes = [6, 1, 16, 16], strides = [1, 1, 1, 1]} : vector<8x3x16x16xbf16> to vector<6x1x16x16xbf16>
    %51 = vector.shape_cast %50 : vector<6x1x16x16xbf16> to vector<6x16x16xbf16>
    %52 = vector.shape_cast %51 : vector<6x16x16xbf16> to vector<96x16xbf16>
    %c0_31 = arith.constant 0 : index
    %c0_32 = arith.constant 0 : index
    %c0_33 = arith.constant 0 : index
    %53 = vector.load %arg6[%c0_31, %c0_32, %c0_33] : memref<6x16x64xbf16, #tpu.memory_space<vmem>>, vector<1x16x64xbf16>
    %54 = vector.shape_cast %53 : vector<1x16x64xbf16> to vector<16x64xbf16>
    %cst_34 = arith.constant dense<0.000000e+00> : vector<96x64xf32>
    %55 = tpu.matmul %52, %54, %cst_34 {dimension_numbers = #tpu.dot_dimension_numbers<[1], [0], [0], [1], [0, 0, 1, 1], [], []>} : vector<96x16xbf16>, vector<16x64xbf16>, vector<96x64xf32> -> vector<96x64xf32>
    %56 = arith.addf %48, %55 : vector<96x64xf32>
    %57 = vector.extract_strided_slice %49 {offsets = [0, 1, 0, 0], sizes = [6, 1, 16, 16], strides = [1, 1, 1, 1]} : vector<8x3x16x16xbf16> to vector<6x1x16x16xbf16>
    %58 = vector.shape_cast %57 : vector<6x1x16x16xbf16> to vector<6x16x16xbf16>
    %59 = vector.shape_cast %58 : vector<6x16x16xbf16> to vector<96x16xbf16>
    %c1_35 = arith.constant 1 : index
    %c0_36 = arith.constant 0 : index
    %c0_37 = arith.constant 0 : index
    %60 = vector.load %arg6[%c1_35, %c0_36, %c0_37] : memref<6x16x64xbf16, #tpu.memory_space<vmem>>, vector<1x16x64xbf16>
    %61 = vector.shape_cast %60 : vector<1x16x64xbf16> to vector<16x64xbf16>
    %cst_38 = arith.constant dense<0.000000e+00> : vector<96x64xf32>
    %62 = tpu.matmul %59, %61, %cst_38 {dimension_numbers = #tpu.dot_dimension_numbers<[1], [0], [0], [1], [0, 0, 1, 1], [], []>} : vector<96x16xbf16>, vector<16x64xbf16>, vector<96x64xf32> -> vector<96x64xf32>
    %63 = arith.addf %56, %62 : vector<96x64xf32>
    %64 = vector.extract_strided_slice %49 {offsets = [0, 2, 0, 0], sizes = [6, 1, 16, 16], strides = [1, 1, 1, 1]} : vector<8x3x16x16xbf16> to vector<6x1x16x16xbf16>
    %65 = vector.shape_cast %64 : vector<6x1x16x16xbf16> to vector<6x16x16xbf16>
    %66 = vector.shape_cast %65 : vector<6x16x16xbf16> to vector<96x16xbf16>
    %c2_39 = arith.constant 2 : index
    %c0_40 = arith.constant 0 : index
    %c0_41 = arith.constant 0 : index
    %67 = vector.load %arg6[%c2_39, %c0_40, %c0_41] : memref<6x16x64xbf16, #tpu.memory_space<vmem>>, vector<1x16x64xbf16>
    %68 = vector.shape_cast %67 : vector<1x16x64xbf16> to vector<16x64xbf16>
    %cst_42 = arith.constant dense<0.000000e+00> : vector<96x64xf32>
    %69 = tpu.matmul %66, %68, %cst_42 {dimension_numbers = #tpu.dot_dimension_numbers<[1], [0], [0], [1], [0, 0, 1, 1], [], []>} : vector<96x16xbf16>, vector<16x64xbf16>, vector<96x64xf32> -> vector<96x64xf32>
    %70 = arith.addf %63, %69 : vector<96x64xf32>
    %71 = vector.extract_strided_slice %49 {offsets = [1, 0, 0, 0], sizes = [6, 1, 16, 16], strides = [1, 1, 1, 1]} : vector<8x3x16x16xbf16> to vector<6x1x16x16xbf16>
    %72 = vector.shape_cast %71 : vector<6x1x16x16xbf16> to vector<6x16x16xbf16>
    %73 = vector.shape_cast %72 : vector<6x16x16xbf16> to vector<96x16xbf16>
    %c3 = arith.constant 3 : index
    %c0_43 = arith.constant 0 : index
    %c0_44 = arith.constant 0 : index
    %74 = vector.load %arg6[%c3, %c0_43, %c0_44] : memref<6x16x64xbf16, #tpu.memory_space<vmem>>, vector<1x16x64xbf16>
    %75 = vector.shape_cast %74 : vector<1x16x64xbf16> to vector<16x64xbf16>
    %cst_45 = arith.constant dense<0.000000e+00> : vector<96x64xf32>
    %76 = tpu.matmul %73, %75, %cst_45 {dimension_numbers = #tpu.dot_dimension_numbers<[1], [0], [0], [1], [0, 0, 1, 1], [], []>} : vector<96x16xbf16>, vector<16x64xbf16>, vector<96x64xf32> -> vector<96x64xf32>
    %77 = arith.addf %70, %76 : vector<96x64xf32>
    %78 = vector.extract_strided_slice %49 {offsets = [1, 1, 0, 0], sizes = [6, 1, 16, 16], strides = [1, 1, 1, 1]} : vector<8x3x16x16xbf16> to vector<6x1x16x16xbf16>
    %79 = vector.shape_cast %78 : vector<6x1x16x16xbf16> to vector<6x16x16xbf16>
    %80 = vector.shape_cast %79 : vector<6x16x16xbf16> to vector<96x16xbf16>
    %c4 = arith.constant 4 : index
    %c0_46 = arith.constant 0 : index
    %c0_47 = arith.constant 0 : index
    %81 = vector.load %arg6[%c4, %c0_46, %c0_47] : memref<6x16x64xbf16, #tpu.memory_space<vmem>>, vector<1x16x64xbf16>
    %82 = vector.shape_cast %81 : vector<1x16x64xbf16> to vector<16x64xbf16>
    %cst_48 = arith.constant dense<0.000000e+00> : vector<96x64xf32>
    %83 = tpu.matmul %80, %82, %cst_48 {dimension_numbers = #tpu.dot_dimension_numbers<[1], [0], [0], [1], [0, 0, 1, 1], [], []>} : vector<96x16xbf16>, vector<16x64xbf16>, vector<96x64xf32> -> vector<96x64xf32>
    %84 = arith.addf %77, %83 : vector<96x64xf32>
    %85 = vector.extract_strided_slice %49 {offsets = [1, 2, 0, 0], sizes = [6, 1, 16, 16], strides = [1, 1, 1, 1]} : vector<8x3x16x16xbf16> to vector<6x1x16x16xbf16>
    %86 = vector.shape_cast %85 : vector<6x1x16x16xbf16> to vector<6x16x16xbf16>
    %87 = vector.shape_cast %86 : vector<6x16x16xbf16> to vector<96x16xbf16>
    %c5 = arith.constant 5 : index
    %c0_49 = arith.constant 0 : index
    %c0_50 = arith.constant 0 : index
    %88 = vector.load %arg6[%c5, %c0_49, %c0_50] : memref<6x16x64xbf16, #tpu.memory_space<vmem>>, vector<1x16x64xbf16>
    %89 = vector.shape_cast %88 : vector<1x16x64xbf16> to vector<16x64xbf16>
    %cst_51 = arith.constant dense<0.000000e+00> : vector<96x64xf32>
    %90 = tpu.matmul %87, %89, %cst_51 {dimension_numbers = #tpu.dot_dimension_numbers<[1], [0], [0], [1], [0, 0, 1, 1], [], []>} : vector<96x16xbf16>, vector<16x64xbf16>, vector<96x64xf32> -> vector<96x64xf32>
    %91 = arith.addf %84, %90 : vector<96x64xf32>
    %c0_52 = arith.constant 0 : index
    %c0_53 = arith.constant 0 : index
    %92 = vector.load %arg7[%c0_52, %c0_53] : memref<1x64xf32, #tpu.memory_space<vmem>>, vector<1x64xf32>
    %93 = vector.broadcast %92 : vector<1x64xf32> to vector<96x64xf32>
    %94 = arith.addf %91, %93 : vector<96x64xf32>
    %cst_54 = arith.constant 0.000000e+00 : f32
    %95 = vector.broadcast %cst_54 : f32 to vector<96x64xf32>
    %96 = arith.maximumf %94, %95 : vector<96x64xf32>
    %97 = vector.shape_cast %96 : vector<96x64xf32> to vector<6x16x64xf32>
    %cst_55 = arith.constant dense<0.000000e+00> : vector<16x64xf32>
    %98 = vector.multi_reduction <add>, %97, %cst_55 [0] : vector<6x16x64xf32> to vector<16x64xf32>
    %c0_56 = arith.constant 0 : index
    %c0_57 = arith.constant 0 : index
    %c128 = arith.constant 128 : index
    %99 = vector.load %arg12[%c0_56, %c0_57, %c128] : memref<1x16x512xf32, #tpu.memory_space<vmem>>, vector<1x16x64xf32>
    %100 = vector.shape_cast %99 : vector<1x16x64xf32> to vector<16x64xf32>
    %101 = vector.shape_cast %98 : vector<16x64xf32> to vector<1x16x64xf32>
    tpu.vector_store %arg12[%c0_56, %c0_57, %c128], %101 {strides = array<i32>} : memref<1x16x512xf32, #tpu.memory_space<vmem>>, vector<1x16x64xf32>,
    %cst_58 = arith.constant 0.000000e+00 : bf16
    %102 = vector.broadcast %cst_58 : bf16 to vector<1x16x64xbf16>
    %103 = arith.truncf %97 : vector<6x16x64xf32> to vector<6x16x64xbf16>
    %cst_59 = arith.constant 0.000000e+00 : bf16
    %104 = vector.broadcast %cst_59 : bf16 to vector<1x16x64xbf16>
    %105 = tpu.concatenate %102, %103, %104 in 0 : vector<1x16x64xbf16>, vector<6x16x64xbf16>, vector<1x16x64xbf16> -> vector<8x16x64xbf16>
    %cst_60 = arith.constant 0.000000e+00 : f32
    %106 = vector.broadcast %cst_60 : f32 to vector<96x64xf32>
    %107 = vector.extract_strided_slice %105 {offsets = [0, 0, 0], sizes = [6, 16, 64], strides = [1, 1, 1]} : vector<8x16x64xbf16> to vector<6x16x64xbf16>
    %108 = vector.shape_cast %107 : vector<6x16x64xbf16> to vector<96x64xbf16>
    %c0_61 = arith.constant 0 : index
    %c0_62 = arith.constant 0 : index
    %c0_63 = arith.constant 0 : index
    %109 = vector.load %arg8[%c0_61, %c0_62, %c0_63] : memref<3x64x64xbf16, #tpu.memory_space<vmem>>, vector<1x64x64xbf16>
    %110 = vector.shape_cast %109 : vector<1x64x64xbf16> to vector<64x64xbf16>
    %cst_64 = arith.constant dense<0.000000e+00> : vector<96x64xf32>
    %111 = tpu.matmul %108, %110, %cst_64 {dimension_numbers = #tpu.dot_dimension_numbers<[1], [0], [0], [1], [0, 0, 1, 1], [], []>} : vector<96x64xbf16>, vector<64x64xbf16>, vector<96x64xf32> -> vector<96x64xf32>
    %112 = arith.addf %106, %111 : vector<96x64xf32>
    %113 = vector.extract_strided_slice %105 {offsets = [1, 0, 0], sizes = [6, 16, 64], strides = [1, 1, 1]} : vector<8x16x64xbf16> to vector<6x16x64xbf16>
    %114 = vector.shape_cast %113 : vector<6x16x64xbf16> to vector<96x64xbf16>
    %c1_65 = arith.constant 1 : index
    %c0_66 = arith.constant 0 : index
    %c0_67 = arith.constant 0 : index
    %115 = vector.load %arg8[%c1_65, %c0_66, %c0_67] : memref<3x64x64xbf16, #tpu.memory_space<vmem>>, vector<1x64x64xbf16>
    %116 = vector.shape_cast %115 : vector<1x64x64xbf16> to vector<64x64xbf16>
    %cst_68 = arith.constant dense<0.000000e+00> : vector<96x64xf32>
    %117 = tpu.matmul %114, %116, %cst_68 {dimension_numbers = #tpu.dot_dimension_numbers<[1], [0], [0], [1], [0, 0, 1, 1], [], []>} : vector<96x64xbf16>, vector<64x64xbf16>, vector<96x64xf32> -> vector<96x64xf32>
    %118 = arith.addf %112, %117 : vector<96x64xf32>
    %119 = vector.extract_strided_slice %105 {offsets = [2, 0, 0], sizes = [6, 16, 64], strides = [1, 1, 1]} : vector<8x16x64xbf16> to vector<6x16x64xbf16>
    %120 = vector.shape_cast %119 : vector<6x16x64xbf16> to vector<96x64xbf16>
    %c2_69 = arith.constant 2 : index
    %c0_70 = arith.constant 0 : index
    %c0_71 = arith.constant 0 : index
    %121 = vector.load %arg8[%c2_69, %c0_70, %c0_71] : memref<3x64x64xbf16, #tpu.memory_space<vmem>>, vector<1x64x64xbf16>
    %122 = vector.shape_cast %121 : vector<1x64x64xbf16> to vector<64x64xbf16>
    %cst_72 = arith.constant dense<0.000000e+00> : vector<96x64xf32>
    %123 = tpu.matmul %120, %122, %cst_72 {dimension_numbers = #tpu.dot_dimension_numbers<[1], [0], [0], [1], [0, 0, 1, 1], [], []>} : vector<96x64xbf16>, vector<64x64xbf16>, vector<96x64xf32> -> vector<96x64xf32>
    %124 = arith.addf %118, %123 : vector<96x64xf32>
    %c0_73 = arith.constant 0 : index
    %c0_74 = arith.constant 0 : index
    %125 = vector.load %arg9[%c0_73, %c0_74] : memref<1x64xf32, #tpu.memory_space<vmem>>, vector<1x64xf32>
    %126 = vector.broadcast %125 : vector<1x64xf32> to vector<96x64xf32>
    %127 = arith.addf %124, %126 : vector<96x64xf32>
    %cst_75 = arith.constant 0.000000e+00 : f32
    %128 = vector.broadcast %cst_75 : f32 to vector<96x64xf32>
    %129 = arith.maximumf %127, %128 : vector<96x64xf32>
    %130 = vector.shape_cast %129 : vector<96x64xf32> to vector<6x16x64xf32>
    %cst_76 = arith.constant dense<0.000000e+00> : vector<16x64xf32>
    %131 = vector.multi_reduction <add>, %130, %cst_76 [0] : vector<6x16x64xf32> to vector<16x64xf32>
    %c0_77 = arith.constant 0 : index
    %c0_78 = arith.constant 0 : index
    %c256 = arith.constant 256 : index
    %132 = vector.load %arg12[%c0_77, %c0_78, %c256] : memref<1x16x512xf32, #tpu.memory_space<vmem>>, vector<1x16x64xf32>
    %133 = vector.shape_cast %132 : vector<1x16x64xf32> to vector<16x64xf32>
    %134 = vector.shape_cast %131 : vector<16x64xf32> to vector<1x16x64xf32>
    tpu.vector_store %arg12[%c0_77, %c0_78, %c256], %134 {strides = array<i32>} : memref<1x16x512xf32, #tpu.memory_space<vmem>>, vector<1x16x64xf32>,
    %cst_79 = arith.constant 0.000000e+00 : bf16
    %135 = vector.broadcast %cst_79 : bf16 to vector<1x16x64xbf16>
    %136 = arith.truncf %130 : vector<6x16x64xf32> to vector<6x16x64xbf16>
    %cst_80 = arith.constant 0.000000e+00 : bf16
    %137 = vector.broadcast %cst_80 : bf16 to vector<2x16x64xbf16>
    %138 = tpu.concatenate %135, %136, %137 in 0 : vector<1x16x64xbf16>, vector<6x16x64xbf16>, vector<2x16x64xbf16> -> vector<9x16x64xbf16>
    %cst_81 = arith.constant 0.000000e+00 : f32
    %139 = vector.broadcast %cst_81 : f32 to vector<16x128xf32>
    %140 = vector.shape_cast %138 : vector<9x16x64xbf16> to vector<3x3x16x64xbf16>
    %141 = vector.extract_strided_slice %140 {offsets = [0, 0, 0, 0], sizes = [1, 1, 16, 64], strides = [1, 1, 1, 1]} : vector<3x3x16x64xbf16> to vector<1x1x16x64xbf16>
    %142 = vector.shape_cast %141 : vector<1x1x16x64xbf16> to vector<1x16x64xbf16>
    %143 = vector.shape_cast %142 : vector<1x16x64xbf16> to vector<16x64xbf16>
    %c0_82 = arith.constant 0 : index
    %c0_83 = arith.constant 0 : index
    %c0_84 = arith.constant 0 : index
    %144 = vector.load %arg10[%c0_82, %c0_83, %c0_84] : memref<6x64x128xbf16, #tpu.memory_space<vmem>>, vector<1x64x128xbf16>
    %145 = vector.shape_cast %144 : vector<1x64x128xbf16> to vector<64x128xbf16>
    %cst_85 = arith.constant dense<0.000000e+00> : vector<16x128xf32>
    %146 = tpu.matmul %143, %145, %cst_85 {dimension_numbers = #tpu.dot_dimension_numbers<[1], [0], [0], [1], [0, 0, 1, 1], [], []>} : vector<16x64xbf16>, vector<64x128xbf16>, vector<16x128xf32> -> vector<16x128xf32>
    %147 = arith.addf %139, %146 : vector<16x128xf32>
    %148 = vector.extract_strided_slice %140 {offsets = [0, 1, 0, 0], sizes = [1, 1, 16, 64], strides = [1, 1, 1, 1]} : vector<3x3x16x64xbf16> to vector<1x1x16x64xbf16>
    %149 = vector.shape_cast %148 : vector<1x1x16x64xbf16> to vector<1x16x64xbf16>
    %150 = vector.shape_cast %149 : vector<1x16x64xbf16> to vector<16x64xbf16>
    %c1_86 = arith.constant 1 : index
    %c0_87 = arith.constant 0 : index
    %c0_88 = arith.constant 0 : index
    %151 = vector.load %arg10[%c1_86, %c0_87, %c0_88] : memref<6x64x128xbf16, #tpu.memory_space<vmem>>, vector<1x64x128xbf16>
    %152 = vector.shape_cast %151 : vector<1x64x128xbf16> to vector<64x128xbf16>
    %cst_89 = arith.constant dense<0.000000e+00> : vector<16x128xf32>
    %153 = tpu.matmul %150, %152, %cst_89 {dimension_numbers = #tpu.dot_dimension_numbers<[1], [0], [0], [1], [0, 0, 1, 1], [], []>} : vector<16x64xbf16>, vector<64x128xbf16>, vector<16x128xf32> -> vector<16x128xf32>
    %154 = arith.addf %147, %153 : vector<16x128xf32>
    %155 = vector.extract_strided_slice %140 {offsets = [0, 2, 0, 0], sizes = [1, 1, 16, 64], strides = [1, 1, 1, 1]} : vector<3x3x16x64xbf16> to vector<1x1x16x64xbf16>
    %156 = vector.shape_cast %155 : vector<1x1x16x64xbf16> to vector<1x16x64xbf16>
    %157 = vector.shape_cast %156 : vector<1x16x64xbf16> to vector<16x64xbf16>
    %c2_90 = arith.constant 2 : index
    %c0_91 = arith.constant 0 : index
    %c0_92 = arith.constant 0 : index
    %158 = vector.load %arg10[%c2_90, %c0_91, %c0_92] : memref<6x64x128xbf16, #tpu.memory_space<vmem>>, vector<1x64x128xbf16>
    %159 = vector.shape_cast %158 : vector<1x64x128xbf16> to vector<64x128xbf16>
    %cst_93 = arith.constant dense<0.000000e+00> : vector<16x128xf32>
    %160 = tpu.matmul %157, %159, %cst_93 {dimension_numbers = #tpu.dot_dimension_numbers<[1], [0], [0], [1], [0, 0, 1, 1], [], []>} : vector<16x64xbf16>, vector<64x128xbf16>, vector<16x128xf32> -> vector<16x128xf32>
    %161 = arith.addf %154, %160 : vector<16x128xf32>
    %162 = vector.extract_strided_slice %140 {offsets = [1, 0, 0, 0], sizes = [1, 1, 16, 64], strides = [1, 1, 1, 1]} : vector<3x3x16x64xbf16> to vector<1x1x16x64xbf16>
    %163 = vector.shape_cast %162 : vector<1x1x16x64xbf16> to vector<1x16x64xbf16>
    %164 = vector.shape_cast %163 : vector<1x16x64xbf16> to vector<16x64xbf16>
    %c3_94 = arith.constant 3 : index
    %c0_95 = arith.constant 0 : index
    %c0_96 = arith.constant 0 : index
    %165 = vector.load %arg10[%c3_94, %c0_95, %c0_96] : memref<6x64x128xbf16, #tpu.memory_space<vmem>>, vector<1x64x128xbf16>
    %166 = vector.shape_cast %165 : vector<1x64x128xbf16> to vector<64x128xbf16>
    %cst_97 = arith.constant dense<0.000000e+00> : vector<16x128xf32>
    %167 = tpu.matmul %164, %166, %cst_97 {dimension_numbers = #tpu.dot_dimension_numbers<[1], [0], [0], [1], [0, 0, 1, 1], [], []>} : vector<16x64xbf16>, vector<64x128xbf16>, vector<16x128xf32> -> vector<16x128xf32>
    %168 = arith.addf %161, %167 : vector<16x128xf32>
    %169 = vector.extract_strided_slice %140 {offsets = [1, 1, 0, 0], sizes = [1, 1, 16, 64], strides = [1, 1, 1, 1]} : vector<3x3x16x64xbf16> to vector<1x1x16x64xbf16>
    %170 = vector.shape_cast %169 : vector<1x1x16x64xbf16> to vector<1x16x64xbf16>
    %171 = vector.shape_cast %170 : vector<1x16x64xbf16> to vector<16x64xbf16>
    %c4_98 = arith.constant 4 : index
    %c0_99 = arith.constant 0 : index
    %c0_100 = arith.constant 0 : index
    %172 = vector.load %arg10[%c4_98, %c0_99, %c0_100] : memref<6x64x128xbf16, #tpu.memory_space<vmem>>, vector<1x64x128xbf16>
    %173 = vector.shape_cast %172 : vector<1x64x128xbf16> to vector<64x128xbf16>
    %cst_101 = arith.constant dense<0.000000e+00> : vector<16x128xf32>
    %174 = tpu.matmul %171, %173, %cst_101 {dimension_numbers = #tpu.dot_dimension_numbers<[1], [0], [0], [1], [0, 0, 1, 1], [], []>} : vector<16x64xbf16>, vector<64x128xbf16>, vector<16x128xf32> -> vector<16x128xf32>
    %175 = arith.addf %168, %174 : vector<16x128xf32>
    %176 = vector.extract_strided_slice %140 {offsets = [1, 2, 0, 0], sizes = [1, 1, 16, 64], strides = [1, 1, 1, 1]} : vector<3x3x16x64xbf16> to vector<1x1x16x64xbf16>
    %177 = vector.shape_cast %176 : vector<1x1x16x64xbf16> to vector<1x16x64xbf16>
    %178 = vector.shape_cast %177 : vector<1x16x64xbf16> to vector<16x64xbf16>
    %c5_102 = arith.constant 5 : index
    %c0_103 = arith.constant 0 : index
    %c0_104 = arith.constant 0 : index
    %179 = vector.load %arg10[%c5_102, %c0_103, %c0_104] : memref<6x64x128xbf16, #tpu.memory_space<vmem>>, vector<1x64x128xbf16>
    %180 = vector.shape_cast %179 : vector<1x64x128xbf16> to vector<64x128xbf16>
    %cst_105 = arith.constant dense<0.000000e+00> : vector<16x128xf32>
    %181 = tpu.matmul %178, %180, %cst_105 {dimension_numbers = #tpu.dot_dimension_numbers<[1], [0], [0], [1], [0, 0, 1, 1], [], []>} : vector<16x64xbf16>, vector<64x128xbf16>, vector<16x128xf32> -> vector<16x128xf32>
    %182 = arith.addf %175, %181 : vector<16x128xf32>
    %c0_106 = arith.constant 0 : index
    %c0_107 = arith.constant 0 : index
    %183 = vector.load %arg11[%c0_106, %c0_107] : memref<1x128xf32, #tpu.memory_space<vmem>>, vector<1x128xf32>
    %184 = vector.broadcast %183 : vector<1x128xf32> to vector<16x128xf32>
    %185 = arith.addf %182, %184 : vector<16x128xf32>
    %cst_108 = arith.constant 0.000000e+00 : f32
    %186 = vector.broadcast %cst_108 : f32 to vector<16x128xf32>
    %187 = arith.maximumf %185, %186 : vector<16x128xf32>
    %188 = vector.shape_cast %187 : vector<16x128xf32> to vector<1x16x128xf32>
    %cst_109 = arith.constant dense<0.000000e+00> : vector<16x128xf32>
    %189 = vector.multi_reduction <add>, %188, %cst_109 [0] : vector<1x16x128xf32> to vector<16x128xf32>
    %c0_110 = arith.constant 0 : index
    %c0_111 = arith.constant 0 : index
    %c384 = arith.constant 384 : index
    %190 = vector.load %arg12[%c0_110, %c0_111, %c384] : memref<1x16x512xf32, #tpu.memory_space<vmem>>, vector<1x16x128xf32>
    %191 = vector.shape_cast %190 : vector<1x16x128xf32> to vector<16x128xf32>
    %192 = vector.shape_cast %189 : vector<16x128xf32> to vector<1x16x128xf32>
    tpu.vector_store %arg12[%c0_110, %c0_111, %c384], %192 {strides = array<i32>} : memref<1x16x512xf32, #tpu.memory_space<vmem>>, vector<1x16x128xf32>,
    return
  }
  func.func @transform_0(%arg0: i32) -> (i32, i32, i32, i32) {
    %c0_i32 = arith.constant 0 : i32
    %c0_i32_0 = arith.constant 0 : i32
    %c0_i32_1 = arith.constant 0 : i32
    %c0_i32_2 = arith.constant 0 : i32
    return %arg0, %c0_i32, %c0_i32_0, %c0_i32_1 : i32, i32, i32, i32
  }
  func.func @transform_1(%arg0: i32) -> (i32, i32) {
    %c0_i32 = arith.constant 0 : i32
    %c0_i32_0 = arith.constant 0 : i32
    %c0_i32_1 = arith.constant 0 : i32
    return %c0_i32, %c0_i32_0 : i32, i32
  }
  func.func @transform_2(%arg0: i32) -> (i32, i32) {
    %c0_i32 = arith.constant 0 : i32
    %c0_i32_0 = arith.constant 0 : i32
    %c0_i32_1 = arith.constant 0 : i32
    return %c0_i32, %c0_i32_0 : i32, i32
  }
  func.func @transform_3(%arg0: i32) -> (i32, i32, i32) {
    %c0_i32 = arith.constant 0 : i32
    %c0_i32_0 = arith.constant 0 : i32
    %c0_i32_1 = arith.constant 0 : i32
    %c0_i32_2 = arith.constant 0 : i32
    return %c0_i32, %c0_i32_0, %c0_i32_1 : i32, i32, i32
  }
  func.func @transform_4(%arg0: i32) -> (i32, i32) {
    %c0_i32 = arith.constant 0 : i32
    %c0_i32_0 = arith.constant 0 : i32
    %c0_i32_1 = arith.constant 0 : i32
    return %c0_i32, %c0_i32_0 : i32, i32
  }
  func.func @transform_5(%arg0: i32) -> (i32, i32, i32) {
    %c0_i32 = arith.constant 0 : i32
    %c0_i32_0 = arith.constant 0 : i32
    %c0_i32_1 = arith.constant 0 : i32
    %c0_i32_2 = arith.constant 0 : i32
    return %c0_i32, %c0_i32_0, %c0_i32_1 : i32, i32, i32
  }
  func.func @transform_6(%arg0: i32) -> (i32, i32) {
    %c0_i32 = arith.constant 0 : i32
    %c0_i32_0 = arith.constant 0 : i32
    %c0_i32_1 = arith.constant 0 : i32
    return %c0_i32, %c0_i32_0 : i32, i32
  }
  func.func @transform_7(%arg0: i32) -> (i32, i32, i32) {
    %c0_i32 = arith.constant 0 : i32
    %c0_i32_0 = arith.constant 0 : i32
    %c0_i32_1 = arith.constant 0 : i32
    %c0_i32_2 = arith.constant 0 : i32
    return %c0_i32, %c0_i32_0, %c0_i32_1 : i32, i32, i32
  }
  func.func @transform_8(%arg0: i32) -> (i32, i32) {
    %c0_i32 = arith.constant 0 : i32
    %c0_i32_0 = arith.constant 0 : i32
    %c0_i32_1 = arith.constant 0 : i32
    return %c0_i32, %c0_i32_0 : i32, i32
  }
  func.func @transform_9(%arg0: i32) -> (i32, i32, i32) {
    %c0_i32 = arith.constant 0 : i32
    %c0_i32_0 = arith.constant 0 : i32
    %c0_i32_1 = arith.constant 0 : i32
    %c0_i32_2 = arith.constant 0 : i32
    return %c0_i32, %c0_i32_0, %c0_i32_1 : i32, i32, i32
  }
  func.func @transform_10(%arg0: i32) -> (i32, i32) {
    %c0_i32 = arith.constant 0 : i32
    %c0_i32_0 = arith.constant 0 : i32
    %c0_i32_1 = arith.constant 0 : i32
    return %c0_i32, %c0_i32_0 : i32, i32
  }
  func.func @transform_11(%arg0: i32) -> (i32, i32, i32) {
    %c0_i32 = arith.constant 0 : i32
    %c0_i32_0 = arith.constant 0 : i32
    %c0_i32_1 = arith.constant 0 : i32
    return %arg0, %c0_i32, %c0_i32_0 : i32, i32, i32
  }
}

</mosaic_0001>

<bundles_post_ra>
// kernel: net_ee_forward.1
= control target key start
LH: loop header
LB: loop body
LE: loop exit
PB: predicated region body
PF: predicated region fallthrough
CT: control target
= control target key end

     0   :  { %s3533_s17 = smov 0   ;;  %s4335_s0 = inlined_call_operand.vmem [shape: bf16[2,21,16,6], index: 0, kind: input, shape index: {}]   ;;  %s4336_s1 = inlined_call_operand.vmem [shape: bf16[6,16], index: 1, kind: input, shape index: {}]   ;;  %s4337_s2 = inlined_call_operand.vmem [shape: f32[1,16], index: 2, kind: input, shape index: {}]   ;;  %s4338_s3 = inlined_call_operand.vmem [shape: bf16[3,16,16], index: 3, kind: input, shape index: {}]   ;;  %s4339_s4 = inlined_call_operand.vmem [shape: f32[1,16], index: 4, kind: input, shape index: {}]   ;;  %s4340_s5 = inlined_call_operand.vmem [shape: bf16[6,16,64], index: 5, kind: input, shape index: {}]   ;;  %s4341_s6 = inlined_call_operand.vmem [shape: f32[1,64], index: 6, kind: input, shape index: {}]   ;;  %s4342_s7 = inlined_call_operand.vmem [shape: bf16[3,64,64], index: 7, kind: input, shape index: {}]   ;;  %s4343_s8 = inlined_call_operand.vmem [shape: f32[1,64], index: 8, kind: input, shape index: {}]   ;;  %s4344_s9 = inlined_call_operand.vmem [shape: bf16[6,64,128], index: 9, kind: input, shape index: {}]   ;;  %s4345_s10 = inlined_call_operand.vmem [shape: f32[1,128], index: 10, kind: input, shape index: {}]   ;;  %s4346_s11 = inlined_call_operand.vmem [shape: f32[2,16,512], index: 11, kind: output, shape index: {}]  }
   0x1 LB: > { %s2895_s18 = sadd.s32 4294967295, %s3470_s17   ;;  %p2899_p0 = scmp.ge.s32.totalorder %s3470_s17, 1  ;;  %s3470_s17 = sphi %s3533_s17, %s21_s17  }
   0x2   : > { %p337_p1 = scmp.lt.s32.totalorder %s3470_s17, 3 }
   0x4   : > { %p338_p2 = pnand %p2899_p0, %p337_p1 }
   0x5   : > { %p377_p3 = scmp.lt.s32.totalorder (!%p338_p2), %s2895_s18, 1 }
   0x6   : > { %341 = sbr.rel (%p338_p2) target bundleno = 1112 (0x458), region = 64 }
   0xb   : > { %v430_v0 = vld [vmem:[%s4336_s1] sm:$0x7]  ;;  %vm604_vm0 = vcmask 1042432   ;;  %s4348_s18 = smov (!%p377_p3, %s2895_s18), 1  ;;  %vm540_vm1 = vcmask 48128   ;;  %v3472_v12 = vmov 0  }
   0xc   : > { %v606_v1 = vsel %vm604_vm0, %v430_v0, 0  ;;  %s3447_s21 = smul.u32 168, %s4348_s18  ;;  %v3399_v10 = vld [vmem:[%s4338_s3] sm:$0xff]  ;;  %v3400_v13 = vld [vmem:[%s4338_s3 + $0x8] sm:$0xff]  ;;  %v3401_v19 = vld [vmem:[%s4338_s3 + $0x10] sm:$0xff]  ;;  %vm922_vm2 = vcmask 130048  }
   0xd   : > { %615 = vmatpush.bf16.msra.mxu0 %v606_v1  ;;  %3445 = vmatpush.bf16.msra.mxu2 %v606_v1  ;;  %v3402_v16 = vld [vmem:[%s4340_s5] sm:$0xff]  ;;  %v3403_v47 = vld [vmem:[%s4340_s5 + $0x8] sm:$0xff]  ;;  %s3377_s23 = sshll.u32 %s4348_s18, 6  ;;  %vm2123_vm3 = vcmask 523264  }
   0xe   : > { %3444 = vmatpush.bf16.msra.mxu1 %v606_v1  ;;  %3446 = vmatpush.bf16.msra.mxu3 %v606_v1  ;;  %s3550_s24 = scalar_lea.vmem %s4335_s0, %s3447_s21  ;;  %v3587_v17 = vld [vmem:[%s4337_s2] ss:$0 sm:$0xff]  ;;  %s4033_s26 = scalar_lea.vmem %s4346_s11, %s3377_s23 }
   0xf   : > { %v3378_v2 = vld [vmem:[%s3550_s24] sm:$0xff]  ;;  %v3379_v3 = vld [vmem:[%s3550_s24 + $0x8] sm:$0xff]  ;;  %v3380_v4 = vld [vmem:[%s3550_s24 + $0x10] sm:$0xff] }
  0x10   : > { %2987 = vmatmul.msk.bf16.vlgmr.msra.gmra.mxu0 %vm540_vm1, %v3378_v2  ;;  %v3381_v5 = vld [vmem:[%s3550_s24 + $0x18] sm:$0xff]  ;;  %v3382_v6 = vld [vmem:[%s3550_s24 + $0x20] sm:$0xff]  ;;  %v3383_v7 = vld [vmem:[%s3550_s24 + $0x28] sm:$0xff] }
  0x11   : > { %v3397_v8 = vld [vmem:[%s3550_s24 + $0x98] sm:$0xff]  ;;  %v3396_v9 = vld [vmem:[%s3550_s24 + $0x90] sm:$0xff]  ;;  %1116 = vmatpush.bf16.msrb.mxu2 %v3399_v10  ;;  %v3398_v15 = vld [vmem:[%s3550_s24 + $0xa0] sm:$0xff]  ;;  %1736 = vmatpush.bf16.msrb.mxu0 %v3403_v47 }
  0x12   : > { %3006 = vmatmul.msk.bf16.vlgmr.msra.gmra.mxu2 %vm540_vm1, %v3397_v8  ;;  %3005 = vmatmul.msk.bf16.vlgmr.msra.gmra.mxu1 %vm540_vm1, %v3396_v9  ;;  %v3384_v11 = vld [vmem:[%s3550_s24 + $0x30] sm:$0xff]  ;;  %v3385_v14 = vld [vmem:[%s3550_s24 + $0x38] sm:$0xff]  ;;  %v3386_v18 = vld [vmem:[%s3550_s24 + $0x40] sm:$0xff] }
  0x13   : > { %993 = vmatpush.bf16.msrb.mxu1 %v3400_v13  ;;  %3007 = vmatmul.msk.bf16.vlgmr.msra.gmra.mxu3 %vm540_vm1, %v3398_v15  ;;  %v3387_v30 = vld [vmem:[%s3550_s24 + $0x48] sm:$0xff]  ;;  %v3388_v42 = vld [vmem:[%s3550_s24 + $0x50] sm:$0xff]  ;;  %v3389_v55 = vld [vmem:[%s3550_s24 + $0x58] sm:$0xff] }
  0x14   : > { %1239 = vmatpush.bf16.msrb.mxu3 %v3401_v19  ;;  %v3404_v8 = vld [vmem:[%s4340_s5 + $0x10] sm:$0xff]  ;;  %v3405_v19 = vld [vmem:[%s4340_s5 + $0x18] sm:$0xff] }
  0x15   : > { %1862 = vmatpush.bf16.msra.mxu2 %v3404_v8 }
  0x17   : > { %1796 = vmatpush.bf16.msra.mxu1 %v3402_v16 }
  0x18   : > { %1925 = vmatpush.bf16.msra.mxu3 %v3405_v19 }
  0x20   : > { %2988 = vmatmul.msk.bf16.gmra.mxu0 %vm540_vm1, %v3379_v3  ;;  %v3390_v3 = vld [vmem:[%s3550_s24 + $0x60] sm:$0xff] }
  0x22   : > { %1117 = vmatmul.bf16.vlgmr.msrb.gmra.mxu2 %v3472_v12 }
  0x30   : > { %2989 = vmatmul.msk.bf16.gmra.mxu0 %vm540_vm1, %v3380_v4 }
  0x40   : > { %2990 = vmatmul.msk.bf16.gmra.mxu0 %vm540_vm1, %v3381_v5 }
  0x50   : > { %2991 = vmatmul.msk.bf16.gmra.mxu0 %vm540_vm1, %v3382_v6 }
  0x60   : > { %2992 = vmatmul.msk.bf16.gmra.mxu0 %vm540_vm1, %v3383_v7 }
  0x70   : > { %2993 = vmatmul.msk.bf16.gmra.mxu0 %vm540_vm1, %v3384_v11 }
  0x80   : > { %2994 = vmatmul.msk.bf16.gmra.mxu0 %vm540_vm1, %v3385_v14 }
  0x8d   : > { %v617_v20 = vpop.f32.mrf.mxu0 }
  0x8e   : > { %v618_v21 = vadd.f32 %v3587_v17, %v617_v20 }
  0x90   : > { %2995 = vmatmul.msk.bf16.gmra.mxu0 %vm540_vm1, %v3386_v18  ;;  %v722_v22 = vmax.f32 %v618_v21, 0.0  ;;  %v3391_v18 = vld [vmem:[%s3550_s24 + $0x68] sm:$0xff] }
  0x92   : > { %v764_v25 = vpack.c.bf16 %v722_v22, %v722_v22 }
  0x94   : > { %v848_v28 = vunpack.c.l.b16 %v764_v25 }
  0x95   : > { %v619_v23 = vpop.f32.mrf.mxu0 }
  0x96   : > { %v620_v24 = vadd.f32 %v3587_v17, %v619_v23 }
  0x98   : > { %v723_v26 = vmax.f32 %v620_v24, 0.0 }
  0x9a   : > { %v765_v27 = vpack.c.bf16 %v723_v26, %v723_v26 }
  0x9c   : > { %v849_v29 = vunpack.c.l.b16 %v765_v27 }
  0x9d   : > { %v622_v31 = vpop.f32.mrf.mxu0 }
  0x9e   : > { %v890_v32 = vpack.c.b16 %v849_v29, %v848_v28  ;;  %v623_v33 = vadd.f32 %v3587_v17, %v622_v31  ;;  %v3392_v31 = vld [vmem:[%s3550_s24 + $0x70] sm:$0xff] }
  0xa0   : > { %2996 = vmatmul.msk.bf16.gmra.mxu0 %vm540_vm1, %v3387_v30  ;;  %3014 = vmatmul.msk.bf16.vlgmr.msrb.gmra.mxu1 %vm922_vm2, %v890_v32  ;;  %v724_v34 = vmax.f32 %v623_v33, 0.0 }
  0xa1   : > { %3039 = vmatmul.msk.bf16.gmra.mxu2 %vm922_vm2, %v890_v32 }
  0xa2   : > { %v766_v37 = vpack.c.bf16 %v724_v34, %v724_v34 }
  0xa4   : > { %v850_v40 = vunpack.c.l.b16 %v766_v37 }
  0xa5   : > { %v624_v35 = vpop.f32.mrf.mxu0 }
  0xa6   : > { %v625_v36 = vadd.f32 %v3587_v17, %v624_v35 }
  0xa8   : > { %v725_v38 = vmax.f32 %v625_v36, 0.0 }
  0xaa   : > { %v767_v39 = vpack.c.bf16 %v725_v38, %v725_v38 }
  0xac   : > { %v851_v41 = vunpack.c.l.b16 %v767_v39 }
  0xad   : > { %v627_v43 = vpop.f32.mrf.mxu0 }
  0xae   : > { %v891_v44 = vpack.c.b16 %v851_v41, %v850_v40  ;;  %v628_v45 = vadd.f32 %v3587_v17, %v627_v43  ;;  %v3393_v43 = vld [vmem:[%s3550_s24 + $0x78] sm:$0xff] }
  0xb0   : > { %2997 = vmatmul.msk.bf16.gmra.mxu0 %vm540_vm1, %v3388_v42  ;;  %3015 = vmatmul.msk.bf16.gmra.mxu1 %vm922_vm2, %v891_v44  ;;  %v726_v46 = vmax.f32 %v628_v45, 0.0 }
  0xb1   : > { %3040 = vmatmul.msk.bf16.gmra.mxu2 %vm922_vm2, %v891_v44  ;;  %3065 = vmatmul.msk.bf16.vlgmr.msrb.gmra.mxu3 %vm922_vm2, %v891_v44  ;;  %v3647_v44 = vpop.f32.mrf.mxu2 }
  0xb2   : > { %v768_v50 = vpack.c.bf16 %v726_v46, %v726_v46 }
  0xb4   : > { %v852_v53 = vunpack.c.l.b16 %v768_v50 }
  0xb5   : > { %v629_v48 = vpop.f32.mrf.mxu0 }
  0xb6   : > { %v630_v49 = vadd.f32 %v3587_v17, %v629_v48 }
  0xb8   : > { %v727_v51 = vmax.f32 %v630_v49, 0.0 }
  0xba   : > { %v769_v52 = vpack.c.bf16 %v727_v51, %v727_v51  ;;  %v3655_v51 = vpop.f32.mrf.mxu2 }
  0xbc   : > { %v853_v54 = vunpack.c.l.b16 %v769_v52 }
  0xbd   : > { %v632_v56 = vpop.f32.mrf.mxu0 }
  0xbe   : > { %v892_v57 = vpack.c.b16 %v853_v54, %v852_v53  ;;  %v633_v58 = vadd.f32 %v3587_v17, %v632_v56 }
  0xc0   : > { %2998 = vmatmul.msk.bf16.gmra.mxu0 %vm540_vm1, %v3389_v55  ;;  %3016 = vmatmul.msk.bf16.gmra.mxu1 %vm922_vm2, %v892_v57  ;;  %v728_v59 = vmax.f32 %v633_v58, 0.0  ;;  %v3657_v55 = vpop.f32.mrf.mxu1  ;;  %v3394_v58 = vld [vmem:[%s3550_s24 + $0x80] sm:$0xff] }
  0xc1   : > { %3041 = vmatmul.msk.bf16.gmra.mxu2 %vm922_vm2, %v892_v57  ;;  %3066 = vmatmul.msk.bf16.gmra.mxu3 %vm922_vm2, %v892_v57 }
  0xc2   : > { %v770_v62 = vpack.c.bf16 %v728_v59, %v728_v59 }
  0xc4   : > { %v854_v1 = vunpack.c.l.b16 %v770_v62  ;;  %v1118_v62 = vpop.f32.mrf.mxu2 }
  0xc5   : > { %v634_v60 = vpop.f32.mrf.mxu0 }
  0xc6   : > { %v635_v61 = vadd.f32 %v3587_v17, %v634_v60 }
  0xc8   : > { %v729_v63 = vmax.f32 %v635_v61, 0.0 }
  0xca   : > { %v771_v0 = vpack.c.bf16 %v729_v63, %v729_v63 }
  0xcc   : > { %v855_v2 = vunpack.c.l.b16 %v771_v0  ;;  %v3665_v0 = vpop.f32.mrf.mxu1 }
  0xcd   : > { %v637_v4 = vpop.f32.mrf.mxu0 }
  0xce   : > { %v893_v5 = vpack.c.b16 %v855_v2, %v854_v1  ;;  %v638_v6 = vadd.f32 %v3587_v17, %v637_v4 }
  0xd0   : > { %2999 = vmatmul.msk.bf16.gmra.mxu0 %vm540_vm1, %v3390_v3  ;;  %3017 = vmatmul.msk.bf16.gmra.mxu1 %vm922_vm2, %v893_v5  ;;  %v730_v7 = vmax.f32 %v638_v6, 0.0  ;;  %v1120_v6 = vpop.f32.mrf.mxu2 }
  0xd1   : > { %3042 = vmatmul.msk.bf16.gmra.mxu2 %vm922_vm2, %v893_v5  ;;  %3067 = vmatmul.msk.bf16.gmra.mxu3 %vm922_vm2, %v893_v5 }
  0xd2   : > { %v772_v11 = vpack.c.bf16 %v730_v7, %v730_v7 }
  0xd4   : > { %v856_v15 = vunpack.c.l.b16 %v772_v11 }
  0xd5   : > { %v639_v9 = vpop.f32.mrf.mxu0 }
  0xd6   : > { %v640_v10 = vadd.f32 %v3587_v17, %v639_v9  ;;  %v3395_v9 = vld [vmem:[%s3550_s24 + $0x88] sm:$0xff] }
  0xd8   : > { %v731_v13 = vmax.f32 %v640_v10, 0.0 }
  0xda   : > { %v773_v14 = vpack.c.bf16 %v731_v13, %v731_v13 }
  0xdc   : > { %v857_v16 = vunpack.c.l.b16 %v773_v14 }
  0xdd   : > { %v642_v20 = vpop.f32.mrf.mxu0 }
  0xde   : > { %v894_v21 = vpack.c.b16 %v857_v16, %v856_v15  ;;  %v643_v22 = vadd.f32 %v3587_v17, %v642_v20  ;;  %v3674_v15 = vpop.f32.mrf.mxu3 }
  0xe0   : > { %3000 = vmatmul.msk.bf16.gmra.mxu0 %vm540_vm1, %v3391_v18  ;;  %3018 = vmatmul.msk.bf16.gmra.mxu1 %vm922_vm2, %v894_v21  ;;  %v732_v23 = vmax.f32 %v643_v22, 0.0 }
  0xe1   : > { %3043 = vmatmul.msk.bf16.gmra.mxu2 %vm922_vm2, %v894_v21  ;;  %3068 = vmatmul.msk.bf16.gmra.mxu3 %vm922_vm2, %v894_v21 }
  0xe2   : > { %v774_v26 = vpack.c.bf16 %v732_v23, %v732_v23 }
  0xe4   : > { %v858_v29 = vunpack.c.l.b16 %v774_v26 }
  0xe5   : > { %v644_v24 = vpop.f32.mrf.mxu0 }
  0xe6   : > { %v645_v25 = vadd.f32 %v3587_v17, %v644_v24 }
  0xe8   : > { %v733_v27 = vmax.f32 %v645_v25, 0.0 }
  0xea   : > { %v775_v28 = vpack.c.bf16 %v733_v27, %v733_v27  ;;  %v3677_v27 = vpop.f32.mrf.mxu3 }
  0xec   : > { %v859_v30 = vunpack.c.l.b16 %v775_v28 }
  0xed   : > { %v647_v32 = vpop.f32.mrf.mxu0 }
  0xee   : > { %v895_v33 = vpack.c.b16 %v859_v30, %v858_v29  ;;  %v648_v34 = vadd.f32 %v3587_v17, %v647_v32 }
  0xf0   : > { %3001 = vmatmul.msk.bf16.gmra.mxu0 %vm540_vm1, %v3392_v31  ;;  %3019 = vmatmul.msk.bf16.gmra.mxu1 %vm922_vm2, %v895_v33  ;;  %v734_v35 = vmax.f32 %v648_v34, 0.0 }
  0xf1   : > { %3044 = vmatmul.msk.bf16.gmra.mxu2 %vm922_vm2, %v895_v33  ;;  %3069 = vmatmul.msk.bf16.gmra.mxu3 %vm922_vm2, %v895_v33 }
  0xf2   : > { %v776_v38 = vpack.c.bf16 %v734_v35, %v734_v35 }
  0xf4   : > { %v860_v41 = vunpack.c.l.b16 %v776_v38 }
  0xf5   : > { %v649_v36 = vpop.f32.mrf.mxu0 }
  0xf6   : > { %v650_v37 = vadd.f32 %v3587_v17, %v649_v36 }
  0xf8   : > { %v735_v39 = vmax.f32 %v650_v37, 0.0 }
  0xfa   : > { %v777_v40 = vpack.c.bf16 %v735_v39, %v735_v39  ;;  %v3686_v39 = vld [vmem:[%s4339_s4] ss:$0 sm:$0xff] }
  0xfc   : > { %v861_v42 = vunpack.c.l.b16 %v777_v40 }
  0xfd   : > { %v652_v45 = vpop.f32.mrf.mxu0 }
  0xfe   : > { %v896_v46 = vpack.c.b16 %v861_v42, %v860_v41  ;;  %v653_v47 = vadd.f32 %v3587_v17, %v652_v45 }
 0x100   : > { %3002 = vmatmul.msk.bf16.gmra.mxu0 %vm540_vm1, %v3393_v43  ;;  %3020 = vmatmul.msk.bf16.gmra.mxu1 %vm922_vm2, %v896_v46  ;;  %v736_v48 = vmax.f32 %v653_v47, 0.0 }
 0x101   : > { %3045 = vmatmul.msk.bf16.gmra.mxu2 %vm922_vm2, %v896_v46  ;;  %3070 = vmatmul.msk.bf16.gmra.mxu3 %vm922_vm2, %v896_v46 }
 0x102   : > { %v778_v52 = vpack.c.bf16 %v736_v48, %v736_v48 }
 0x104   : > { %v862_v56 = vunpack.c.l.b16 %v778_v52 }
 0x105   : > { %v654_v49 = vpop.f32.mrf.mxu0 }
 0x106   : > { %v655_v50 = vadd.f32 %v3587_v17, %v654_v49 }
 0x108   : > { %v737_v53 = vmax.f32 %v655_v50, 0.0 }
 0x10a   : > { %v779_v54 = vpack.c.bf16 %v737_v53, %v737_v53 }
 0x10c   : > { %v863_v57 = vunpack.c.l.b16 %v779_v54 }
 0x10d   : > { %v657_v59 = vpop.f32.mrf.mxu0 }
 0x10e   : > { %v897_v60 = vpack.c.b16 %v863_v57, %v862_v56  ;;  %v658_v61 = vadd.f32 %v3587_v17, %v657_v59 }
 0x110   : > { %3003 = vmatmul.msk.bf16.gmra.mxu0 %vm540_vm1, %v3394_v58  ;;  %3021 = vmatmul.msk.bf16.gmra.mxu1 %vm922_vm2, %v897_v60  ;;  %v738_v63 = vmax.f32 %v658_v61, 0.0 }
 0x111   : > { %3046 = vmatmul.msk.bf16.gmra.mxu2 %vm922_vm2, %v897_v60  ;;  %3071 = vmatmul.msk.bf16.gmra.mxu3 %vm922_vm2, %v897_v60 }
 0x112   : > { %v780_v3 = vpack.c.bf16 %v738_v63, %v738_v63 }
 0x114   : > { %v864_v7 = vunpack.c.l.b16 %v780_v3 }
 0x115   : > { %v659_v1 = vpop.f32.mrf.mxu0 }
 0x116   : > { %v660_v2 = vadd.f32 %v3587_v17, %v659_v1 }
 0x118   : > { %v739_v4 = vmax.f32 %v660_v2, 0.0 }
 0x11a   : > { %v781_v5 = vpack.c.bf16 %v739_v4, %v739_v4 }
 0x11c   : > { %v865_v8 = vunpack.c.l.b16 %v781_v5 }
 0x11d   : > { %v662_v10 = vpop.f32.mrf.mxu0  ;;  %v995_v11 = vpop.f32.mrf.mxu1 }
 0x11e   : > { %v898_v13 = vpack.c.b16 %v865_v8, %v864_v7  ;;  %v663_v14 = vadd.f32 %v3587_v17, %v662_v10  ;;  %v1119_v34 = vadd.f32 %v1118_v62, %v995_v11 }
 0x120   : > { %3004 = vmatmul.msk.bf16.gmra.mxu0 %vm540_vm1, %v3395_v9  ;;  %3022 = vmatmul.msk.bf16.gmra.mxu1 %vm922_vm2, %v898_v13  ;;  %v740_v16 = vmax.f32 %v663_v14, 0.0 }
 0x121   : > { %3047 = vmatmul.msk.bf16.gmra.mxu2 %vm922_vm2, %v898_v13  ;;  %3072 = vmatmul.msk.bf16.gmra.mxu3 %vm922_vm2, %v898_v13 }
 0x122   : > { %v782_v22 = vpack.c.bf16 %v740_v16, %v740_v16 }
 0x124   : > { %v1123_v18 = vpop.f32.mrf.mxu2  ;;  %v866_v25 = vunpack.c.l.b16 %v782_v22 }
 0x125   : > { %v664_v19 = vpop.f32.mrf.mxu0  ;;  %v997_v20 = vpop.f32.mrf.mxu1 }
 0x126   : > { %v665_v21 = vadd.f32 %v3587_v17, %v664_v19  ;;  %v1121_v49 = vadd.f32 %v1120_v6, %v997_v20 }
 0x128   : > { %v741_v23 = vmax.f32 %v665_v21, 0.0 }
 0x12a   : > { %v783_v24 = vpack.c.bf16 %v741_v23, %v741_v23 }
 0x12c   : > { %v867_v26 = vunpack.c.l.b16 %v783_v24  ;;  %v1125_v28 = vpop.f32.mrf.mxu2 }
 0x12d   : > { %v667_v29 = vpop.f32.mrf.mxu0  ;;  %v1000_v30 = vpop.f32.mrf.mxu1 }
 0x12e   : > { %v1124_v31 = vadd.f32 %v1123_v18, %v1000_v30  ;;  %v899_v32 = vpack.c.b16 %v867_v26, %v866_v25  ;;  %v668_v33 = vadd.f32 %v3587_v17, %v667_v29 }
 0x130   : > { %3023 = vmatmul.msk.bf16.gmra.mxu1 %vm922_vm2, %v899_v32  ;;  %v742_v35 = vmax.f32 %v668_v33, 0.0 }
 0x131   : > { %3048 = vmatmul.msk.bf16.gmra.mxu2 %vm922_vm2, %v899_v32  ;;  %3073 = vmatmul.msk.bf16.gmra.mxu3 %vm922_vm2, %v899_v32 }
 0x132   : > { %v784_v45 = vpack.c.bf16 %v742_v35, %v742_v35 }
 0x134   : > { %v1128_v36 = vpop.f32.mrf.mxu2  ;;  %v1241_v37 = vpop.f32.mrf.mxu3  ;;  %v868_v50 = vunpack.c.l.b16 %v784_v45 }
 0x135   : > { %v1346_v38 = vadd.f32 %v1241_v37, %v1119_v34  ;;  %v669_v40 = vpop.f32.mrf.mxu0  ;;  %v1002_v41 = vpop.f32.mrf.mxu1 }
 0x136   : > { %v670_v42 = vadd.f32 %v3587_v17, %v669_v40  ;;  %v1126_v43 = vadd.f32 %v1125_v28, %v1002_v41 }
 0x137   : > { %v1392_v47 = vadd.f32 %v3686_v39, %v1346_v38 }
 0x138   : > { %v743_v46 = vmax.f32 %v670_v42, 0.0 }
 0x139   : > { %v1434_v56 = vmax.f32 %v1392_v47, 0.0 }
 0x13a   : > { %v785_v48 = vpack.c.bf16 %v743_v46, %v743_v46 }
 0x13b   : > { %v1560_v1 = vpack.c.bf16 %v1434_v56, %v1434_v56  ;;  %v1476_v23 = vsel %vm922_vm2, %v1434_v56, 0.0 }
 0x13c   : > { %v869_v52 = vunpack.c.l.b16 %v785_v48  ;;  %v1130_v53 = vpop.f32.mrf.mxu2  ;;  %v1243_v54 = vpop.f32.mrf.mxu3 }
 0x13d   : > { %v1347_v57 = vadd.f32 %v1243_v54, %v1121_v49  ;;  %v672_v58 = vpop.f32.mrf.mxu0  ;;  %v1005_v59 = vpop.f32.mrf.mxu1  ;;  %v1640_v7 = vunpack.c.l.b16 %v1560_v1 }
 0x13e   : > { %v1129_v60 = vadd.f32 %v1128_v36, %v1005_v59  ;;  %v900_v61 = vpack.c.b16 %v869_v52, %v868_v50  ;;  %v673_v63 = vadd.f32 %v3587_v17, %v672_v58 }
 0x13f   : > { %v1393_v62 = vadd.f32 %v3686_v39, %v1347_v57 }
 0x140   : > { %3024 = vmatmul.msk.bf16.gmra.mxu1 %vm922_vm2, %v900_v61  ;;  %v744_v4 = vmax.f32 %v673_v63, 0.0 }
 0x141   : > { %v1435_v2 = vmax.f32 %v1393_v62, 0.0  ;;  %3049 = vmatmul.msk.bf16.gmra.mxu2 %vm922_vm2, %v900_v61  ;;  %3074 = vmatmul.msk.bf16.gmra.mxu3 %vm922_vm2, %v900_v61 }
 0x142   : > { %v786_v19 = vpack.c.bf16 %v744_v4, %v744_v4 }
 0x143   : > { %v1561_v3 = vpack.c.bf16 %v1435_v2, %v1435_v2  ;;  %v1517_v40 = vsel %vm922_vm2, %v1435_v2, 0.0 }
 0x144   : > { %v3695_v5 = vpop.f32.mrf.mxu2  ;;  %v1246_v6 = vpop.f32.mrf.mxu3  ;;  %v870_v25 = vunpack.c.l.b16 %v786_v19 }
 0x145   : > { %v1641_v8 = vunpack.c.l.b16 %v1561_v3  ;;  %v1348_v9 = vadd.f32 %v1246_v6, %v1124_v31  ;;  %v674_v10 = vpop.f32.mrf.mxu0  ;;  %v1007_v11 = vpop.f32.mrf.mxu1 }
 0x146   : > { %v675_v13 = vadd.f32 %v3587_v17, %v674_v10  ;;  %v1131_v14 = vadd.f32 %v1130_v53, %v1007_v11 }
 0x147   : > { %v1680_v16 = vpack.c.b16 %v1641_v8, %v1640_v7  ;;  %v1394_v18 = vadd.f32 %v3686_v39, %v1348_v9 }
 0x148   : > { %v745_v20 = vmax.f32 %v675_v13, 0.0 }
 0x149   : > { %v1436_v21 = vmax.f32 %v1394_v18, 0.0  ;;  %3091 = vmatmul.msk.bf16.vlgmr.msrb.gmra.mxu0 %vm922_vm2, %v1680_v16 }
 0x14a   : > { %v787_v22 = vpack.c.bf16 %v745_v20, %v745_v20 }
 0x14b   : > { %v1477_v24 = vsel %vm922_vm2, %v1436_v21, 0.0  ;;  %v1562_v37 = vpack.c.bf16 %v1436_v21, %v1436_v21 }
 0x14c   : > { %v1478_v26 = vadd.f32 %v1477_v24, %v1476_v23  ;;  %v871_v28 = vunpack.c.l.b16 %v787_v22  ;;  %v3702_v29 = vpop.f32.mrf.mxu2  ;;  %v1248_v30 = vpop.f32.mrf.mxu3 }
 0x14d   : > { %v1349_v31 = vadd.f32 %v1248_v30, %v1126_v43  ;;  %v677_v32 = vpop.f32.mrf.mxu0  ;;  %v1010_v33 = vpop.f32.mrf.mxu1  ;;  %v3711_v48 = vunpack.c.l.b16 %v1562_v37 }
 0x14e   : > { %v901_v34 = vpack.c.b16 %v871_v28, %v870_v25  ;;  %v678_v36 = vadd.f32 %v3587_v17, %v677_v32  ;;  %v1134_v19 = vadd.f32 %v3695_v5, %v1010_v33 }
 0x14f   : > { %v1395_v35 = vadd.f32 %v3686_v39, %v1349_v31 }
 0x150   : > { %3025 = vmatmul.msk.bf16.gmra.mxu1 %vm922_vm2, %v901_v34  ;;  %v746_v45 = vmax.f32 %v678_v36, 0.0 }
 0x151   : > { %v1437_v38 = vmax.f32 %v1395_v35, 0.0  ;;  %3050 = vmatmul.msk.bf16.gmra.mxu2 %vm922_vm2, %v901_v34  ;;  %3075 = vmatmul.msk.bf16.gmra.mxu3 %vm922_vm2, %v901_v34 }
 0x152   : > { %v788_v58 = vpack.c.bf16 %v746_v45, %v746_v45 }
 0x153   : > { %v1518_v41 = vsel %vm922_vm2, %v1437_v38, 0.0  ;;  %v1563_v42 = vpack.c.bf16 %v1437_v38, %v1437_v38 }
 0x154   : > { %v1519_v43 = vadd.f32 %v1518_v41, %v1517_v40  ;;  %v1138_v46 = vpop.f32.mrf.mxu2  ;;  %v1251_v47 = vpop.f32.mrf.mxu3  ;;  %v872_v1 = vunpack.c.l.b16 %v788_v58 }
 0x155   : > { %v3713_v49 = vunpack.c.l.b16 %v1563_v42  ;;  %v1350_v50 = vadd.f32 %v1251_v47, %v1129_v60  ;;  %v679_v52 = vpop.f32.mrf.mxu0  ;;  %v1012_v53 = vpop.f32.mrf.mxu1 }
 0x156   : > { %v680_v54 = vadd.f32 %v3587_v17, %v679_v52  ;;  %v1136_v40 = vadd.f32 %v3702_v29, %v1012_v53 }
 0x157   : > { %v1681_v56 = vpack.c.b16 %v3713_v49, %v3711_v48  ;;  %v1396_v57 = vadd.f32 %v3686_v39, %v1350_v50 }
 0x158   : > { %v747_v59 = vmax.f32 %v680_v54, 0.0 }
 0x159   : > { %v1438_v61 = vmax.f32 %v1396_v57, 0.0 }
 0x15a   : > { %v789_v62 = vpack.c.bf16 %v747_v59, %v747_v59 }
 0x15b   : > { %v1479_v63 = vsel %vm922_vm2, %v1438_v61, 0.0  ;;  %v1564_v16 = vpack.c.bf16 %v1438_v61, %v1438_v61 }
 0x15c   : > { %v1480_v2 = vadd.f32 %v1479_v63, %v1478_v26  ;;  %v873_v3 = vunpack.c.l.b16 %v789_v62  ;;  %v1140_v4 = vpop.f32.mrf.mxu2  ;;  %v1253_v60 = vpop.f32.mrf.mxu3 }
 0x15d   : > { %v1351_v6 = vadd.f32 %v1253_v60, %v1131_v14  ;;  %v682_v7 = vpop.f32.mrf.mxu0  ;;  %v1015_v8 = vpop.f32.mrf.mxu1  ;;  %v1644_v25 = vunpack.c.l.b16 %v1564_v16 }
 0x15e   : > { %v902_v9 = vpack.c.b16 %v873_v3, %v872_v1  ;;  %v1139_v10 = vadd.f32 %v1138_v46, %v1015_v8  ;;  %v683_v13 = vadd.f32 %v3587_v17, %v682_v7 }
 0x15f   : > { %v1397_v11 = vadd.f32 %v3686_v39, %v1351_v6 }
 0x160   : > { %3026 = vmatmul.msk.bf16.gmra.mxu1 %vm922_vm2, %v902_v9  ;;  %v748_v22 = vmax.f32 %v683_v13, 0.0 }
 0x161   : > { %v1439_v18 = vmax.f32 %v1397_v11, 0.0  ;;  %3051 = vmatmul.msk.bf16.gmra.mxu2 %vm922_vm2, %v902_v9  ;;  %3076 = vmatmul.msk.bf16.gmra.mxu3 %vm922_vm2, %v902_v9 }
 0x162   : > { %v790_v5 = vpack.c.bf16 %v748_v22, %v748_v22 }
 0x163   : > { %v1520_v14 = vsel %vm922_vm2, %v1439_v18, 0.0  ;;  %v1565_v20 = vpack.c.bf16 %v1439_v18, %v1439_v18 }
 0x164   : > { %v1521_v21 = vadd.f32 %v1520_v14, %v1519_v43  ;;  %v1143_v23 = vpop.f32.mrf.mxu2  ;;  %v1256_v24 = vpop.f32.mrf.mxu3  ;;  %v874_v42 = vunpack.c.l.b16 %v790_v5 }
 0x165   : > { %v1645_v26 = vunpack.c.l.b16 %v1565_v20  ;;  %v1352_v28 = vadd.f32 %v1256_v24, %v1134_v19  ;;  %v684_v30 = vpop.f32.mrf.mxu0  ;;  %v1017_v31 = vpop.f32.mrf.mxu1 }
 0x166   : > { %v685_v32 = vadd.f32 %v3587_v17, %v684_v30  ;;  %v1141_v34 = vadd.f32 %v1140_v4, %v1017_v31 }
 0x167   : > { %v1398_v35 = vadd.f32 %v3686_v39, %v1352_v28  ;;  %v3729_v36 = vpack.c.b16 %v1645_v26, %v1644_v25 }
 0x168   : > { %v749_v33 = vmax.f32 %v685_v32, 0.0 }
 0x169   : > { %v1440_v37 = vmax.f32 %v1398_v35, 0.0 }
 0x16a   : > { %v791_v38 = vpack.c.bf16 %v749_v33, %v749_v33 }
 0x16b   : > { %v1481_v41 = vsel %vm922_vm2, %v1440_v37, 0.0  ;;  %v1566_v62 = vpack.c.bf16 %v1440_v37, %v1440_v37 }
 0x16c   : > { %v1482_v43 = vadd.f32 %v1481_v41, %v1480_v2  ;;  %v875_v45 = vunpack.c.l.b16 %v791_v38  ;;  %v1145_v46 = vpop.f32.mrf.mxu2  ;;  %v1258_v47 = vpop.f32.mrf.mxu3 }
 0x16d   : > { %v1353_v50 = vadd.f32 %v1258_v47, %v1136_v40  ;;  %v687_v52 = vpop.f32.mrf.mxu0  ;;  %v1020_v54 = vpop.f32.mrf.mxu1  ;;  %v1646_v60 = vunpack.c.l.b16 %v1566_v62 }
 0x16e   : > { %v903_v57 = vpack.c.b16 %v875_v45, %v874_v42  ;;  %v1144_v58 = vadd.f32 %v1143_v23, %v1020_v54  ;;  %v688_v61 = vadd.f32 %v3587_v17, %v687_v52 }
 0x16f   : > { %v1399_v59 = vadd.f32 %v3686_v39, %v1353_v50 }
 0x170   : > { %3027 = vmatmul.msk.bf16.gmra.mxu1 %vm922_vm2, %v903_v57  ;;  %v750_v2 = vmax.f32 %v688_v61, 0.0 }
 0x171   : > { %v1441_v29 = vmax.f32 %v1399_v59, 0.0  ;;  %3052 = vmatmul.msk.bf16.gmra.mxu2 %vm922_vm2, %v903_v57  ;;  %3077 = vmatmul.msk.bf16.gmra.mxu3 %vm922_vm2, %v903_v57 }
 0x172   : > { %v792_v19 = vpack.c.bf16 %v750_v2, %v750_v2 }
 0x173   : > { %v1522_v53 = vsel %vm922_vm2, %v1441_v29, 0.0  ;;  %v1567_v63 = vpack.c.bf16 %v1441_v29, %v1441_v29 }
 0x174   : > { %v1523_v1 = vadd.f32 %v1522_v53, %v1521_v21  ;;  %v3739_v3 = vpop.f32.mrf.mxu2  ;;  %v1261_v4 = vpop.f32.mrf.mxu3  ;;  %v876_v23 = vunpack.c.l.b16 %v792_v19 }
 0x175   : > { %v1647_v6 = vunpack.c.l.b16 %v1567_v63  ;;  %v1354_v7 = vadd.f32 %v1261_v4, %v1139_v10  ;;  %v689_v8 = vpop.f32.mrf.mxu0  ;;  %v1022_v9 = vpop.f32.mrf.mxu1 }
 0x176   : > { %v690_v11 = vadd.f32 %v3587_v17, %v689_v8  ;;  %v1146_v13 = vadd.f32 %v1145_v46, %v1022_v9 }
 0x177   : > { %v1400_v16 = vadd.f32 %v3686_v39, %v1354_v7  ;;  %v3743_v18 = vpack.c.b16 %v1647_v6, %v1646_v60 }
 0x178   : > { %v751_v14 = vmax.f32 %v690_v11, 0.0 }
 0x179   : > { %v1442_v20 = vmax.f32 %v1400_v16, 0.0  ;;  %3092 = vmatmul.msk.bf16.gmra.mxu0 %vm922_vm2, %v3743_v18 }
 0x17a   : > { %v793_v21 = vpack.c.bf16 %v751_v14, %v751_v14 }
 0x17b   : > { %v1483_v22 = vsel %vm922_vm2, %v1442_v20, 0.0  ;;  %v1568_v33 = vpack.c.bf16 %v1442_v20, %v1442_v20 }
 0x17c   : > { %v1484_v10 = vadd.f32 %v1483_v22, %v1482_v43  ;;  %v877_v24 = vunpack.c.l.b16 %v793_v21  ;;  %v3748_v25 = vpop.f32.mrf.mxu2  ;;  %v1263_v26 = vpop.f32.mrf.mxu3 }
 0x17d   : > { %v1355_v28 = vadd.f32 %v1263_v26, %v1141_v34  ;;  %v692_v30 = vpop.f32.mrf.mxu0  ;;  %v1025_v31 = vpop.f32.mrf.mxu1  ;;  %v1648_v45 = vunpack.c.l.b16 %v1568_v33 }
 0x17e   : > { %v904_v32 = vpack.c.b16 %v877_v24, %v876_v23  ;;  %v693_v5 = vadd.f32 %v3587_v17, %v692_v30  ;;  %v1149_v21 = vadd.f32 %v3739_v3, %v1025_v31 }
 0x17f   : > { %v1401_v35 = vadd.f32 %v3686_v39, %v1355_v28 }
 0x180   : > { %3028 = vmatmul.msk.bf16.gmra.mxu1 %vm922_vm2, %v904_v32  ;;  %v752_v34 = vmax.f32 %v693_v5, 0.0 }
 0x181   : > { %v1443_v37 = vmax.f32 %v1401_v35, 0.0  ;;  %3053 = vmatmul.msk.bf16.gmra.mxu2 %vm922_vm2, %v904_v32  ;;  %3078 = vmatmul.msk.bf16.gmra.mxu3 %vm922_vm2, %v904_v32 }
 0x182   : > { %v794_v61 = vpack.c.bf16 %v752_v34, %v752_v34 }
 0x183   : > { %v1524_v38 = vsel %vm922_vm2, %v1443_v37, 0.0  ;;  %v1569_v40 = vpack.c.bf16 %v1443_v37, %v1443_v37 }
 0x184   : > { %v1525_v41 = vadd.f32 %v1524_v38, %v1523_v1  ;;  %v1153_v42 = vpop.f32.mrf.mxu2  ;;  %v1266_v43 = vpop.f32.mrf.mxu3  ;;  %v878_v1 = vunpack.c.l.b16 %v794_v61 }
 0x185   : > { %v1649_v46 = vunpack.c.l.b16 %v1569_v40  ;;  %v1356_v47 = vadd.f32 %v1266_v43, %v1144_v58  ;;  %v694_v50 = vpop.f32.mrf.mxu0  ;;  %v1027_v52 = vpop.f32.mrf.mxu1 }
 0x186   : > { %v695_v54 = vadd.f32 %v3587_v17, %v694_v50 }
 0x187   : > { %v1402_v57 = vadd.f32 %v3686_v39, %v1356_v47  ;;  %v3758_v59 = vpack.c.b16 %v1649_v46, %v1648_v45 }
 0x188   : > { %v753_v62 = vmax.f32 %v695_v54, 0.0 }
 0x189   : > { %v1444_v29 = vmax.f32 %v1402_v57, 0.0 }
 0x18a   : > { %v795_v53 = vpack.c.bf16 %v753_v62, %v753_v62 }
 0x18b   : > { %v1485_v63 = vsel %vm922_vm2, %v1444_v29, 0.0  ;;  %v1570_v14 = vpack.c.bf16 %v1444_v29, %v1444_v29 }
 0x18c   : > { %v1486_v2 = vadd.f32 %v1485_v63, %v1484_v10  ;;  %v879_v4 = vunpack.c.l.b16 %v795_v53  ;;  %v1155_v60 = vpop.f32.mrf.mxu2  ;;  %v1268_v6 = vpop.f32.mrf.mxu3 }
 0x18d   : > { %v1357_v58 = vadd.f32 %v1268_v6, %v1146_v13  ;;  %v697_v7 = vpop.f32.mrf.mxu0  ;;  %v1030_v8 = vpop.f32.mrf.mxu1  ;;  %v1650_v28 = vunpack.c.l.b16 %v1570_v14 }
 0x18e   : > { %v905_v9 = vpack.c.b16 %v879_v4, %v878_v1  ;;  %v1154_v11 = vadd.f32 %v1153_v42, %v1030_v8  ;;  %v698_v19 = vadd.f32 %v3587_v17, %v697_v7 }
 0x18f   : > { %v1403_v16 = vadd.f32 %v3686_v39, %v1357_v58 }
 0x190   : > { %3029 = vmatmul.msk.bf16.gmra.mxu1 %vm922_vm2, %v905_v9  ;;  %v754_v10 = vmax.f32 %v698_v19, 0.0 }
 0x191   : > { %v1445_v20 = vmax.f32 %v1403_v16, 0.0  ;;  %3054 = vmatmul.msk.bf16.gmra.mxu2 %vm922_vm2, %v905_v9  ;;  %3079 = vmatmul.msk.bf16.gmra.mxu3 %vm922_vm2, %v905_v9 }
 0x192   : > { %v796_v3 = vpack.c.bf16 %v754_v10, %v754_v10 }
 0x193   : > { %v1526_v13 = vsel %vm922_vm2, %v1445_v20, 0.0  ;;  %v1571_v22 = vpack.c.bf16 %v1445_v20, %v1445_v20 }
 0x194   : > { %v1527_v23 = vadd.f32 %v1526_v13, %v1525_v41  ;;  %v1158_v24 = vpop.f32.mrf.mxu2  ;;  %v1271_v26 = vpop.f32.mrf.mxu3  ;;  %v1151_v41 = vadd.f32 %v3748_v25, %v1027_v52  ;;  %v880_v45 = vunpack.c.l.b16 %v796_v3  ;;  %v708_v3 = vadd.f32 %v3587_v17, %v3657_v55 }
 0x195   : > { %v1651_v30 = vunpack.c.l.b16 %v1571_v22  ;;  %v1358_v32 = vadd.f32 %v1271_v26, %v1149_v21  ;;  %v699_v35 = vpop.f32.mrf.mxu0  ;;  %v1032_v5 = vpop.f32.mrf.mxu1 }
 0x196   : > { %v700_v33 = vadd.f32 %v3587_v17, %v699_v35  ;;  %v1156_v37 = vadd.f32 %v1155_v60, %v1032_v5 }
 0x197   : > { %v1404_v38 = vadd.f32 %v3686_v39, %v1358_v32  ;;  %v3770_v40 = vpack.c.b16 %v1651_v30, %v1650_v28 }
 0x198   : > { %v755_v31 = vmax.f32 %v700_v33, 0.0 }
 0x199   : > { %v1446_v34 = vmax.f32 %v1404_v38, 0.0 }
 0x19a   : > { %v797_v42 = vpack.c.bf16 %v755_v31, %v755_v31  ;;  %v710_v31 = vadd.f32 %v3587_v17, %v3665_v0 }
 0x19b   : > { %v1487_v43 = vsel %vm922_vm2, %v1446_v34, 0.0  ;;  %v1572_v4 = vpack.c.bf16 %v1446_v34, %v1446_v34 }
 0x19c   : > { %v1488_v46 = vadd.f32 %v1487_v43, %v1486_v2  ;;  %v881_v47 = vunpack.c.l.b16 %v797_v42  ;;  %v1160_v50 = vpop.f32.mrf.mxu2  ;;  %v1273_v54 = vpop.f32.mrf.mxu3 }
 0x19d   : > { %v1359_v57 = vadd.f32 %v1273_v54, %v1151_v41  ;;  %v702_v61 = vpop.f32.mrf.mxu0  ;;  %v1035_v62 = vpop.f32.mrf.mxu1  ;;  %v1652_v8 = vunpack.c.l.b16 %v1572_v4 }
 0x19e   : > { %v906_v29 = vpack.c.b16 %v881_v47, %v880_v45  ;;  %v1159_v53 = vadd.f32 %v1158_v24, %v1035_v62  ;;  %v703_v1 = vadd.f32 %v3587_v17, %v702_v61  ;;  %v758_v45 = vmax.f32 %v708_v3, 0.0 }
 0x19f   : > { %v1405_v63 = vadd.f32 %v3686_v39, %v1359_v57 }
 0x1a0   : > { %3030 = vmatmul.msk.bf16.gmra.mxu1 %vm922_vm2, %v906_v29  ;;  %v756_v6 = vmax.f32 %v703_v1, 0.0 }
 0x1a1   : > { %v1447_v25 = vmax.f32 %v1405_v63, 0.0  ;;  %3055 = vmatmul.msk.bf16.gmra.mxu2 %vm922_vm2, %v906_v29  ;;  %3080 = vmatmul.msk.bf16.gmra.mxu3 %vm922_vm2, %v906_v29  ;;  %v800_v29 = vpack.c.bf16 %v758_v45, %v758_v45 }
 0x1a2   : > { %v798_v10 = vpack.c.bf16 %v756_v6, %v756_v6 }
 0x1a3   : > { %v1528_v52 = vsel %vm922_vm2, %v1447_v25, 0.0  ;;  %v1573_v2 = vpack.c.bf16 %v1447_v25, %v1447_v25 }
 0x1a4   : > { %v1529_v60 = vadd.f32 %v1528_v52, %v1527_v23  ;;  %v3780_v58 = vpop.f32.mrf.mxu2  ;;  %v1276_v7 = vpop.f32.mrf.mxu3  ;;  %v882_v30 = vunpack.c.l.b16 %v798_v10  ;;  %v884_v52 = vunpack.c.l.b16 %v800_v29 }
 0x1a5   : > { %v1653_v9 = vunpack.c.l.b16 %v1573_v2  ;;  %v1360_v16 = vadd.f32 %v1276_v7, %v1154_v11  ;;  %v704_v19 = vpop.f32.mrf.mxu0  ;;  %v1037_v14 = vpop.f32.mrf.mxu1 }
 0x1a6   : > { %v705_v20 = vadd.f32 %v3587_v17, %v704_v19  ;;  %v1161_v21 = vadd.f32 %v1160_v50, %v1037_v14  ;;  %v715_v19 = vadd.f32 %v3587_v17, %v3655_v51 }
 0x1a7   : > { %v1406_v13 = vadd.f32 %v3686_v39, %v1360_v16  ;;  %v3784_v22 = vpack.c.b16 %v1653_v9, %v1652_v8 }
 0x1a8   : > { %v757_v24 = vmax.f32 %v705_v20, 0.0 }
 0x1a9   : > { %v1448_v26 = vmax.f32 %v1406_v13, 0.0  ;;  %3093 = vmatmul.msk.bf16.gmra.mxu0 %vm922_vm2, %v3784_v22 }
 0x1aa   : > { %v799_v23 = vpack.c.bf16 %v757_v24, %v757_v24 }
 0x1ab   : > { %v1489_v28 = vsel %vm922_vm2, %v1448_v26, 0.0  ;;  %v1574_v41 = vpack.c.bf16 %v1448_v26, %v1448_v26 }
 0x1ac   : > { %v1490_v11 = vadd.f32 %v1489_v28, %v1488_v46  ;;  %v883_v32 = vunpack.c.l.b16 %v799_v23  ;;  %v3789_v35 = vpop.f32.mrf.mxu2  ;;  %v1278_v5 = vpop.f32.mrf.mxu3 }
 0x1ad   : > { %v1361_v33 = vadd.f32 %v1278_v5, %v1156_v37  ;;  %v1040_v38 = vpop.f32.mrf.mxu1  ;;  %v759_v37 = vmax.f32 %v710_v31, 0.0  ;;  %v1654_v54 = vunpack.c.l.b16 %v1574_v41 }
 0x1ae   : > { %v907_v34 = vpack.c.b16 %v883_v32, %v882_v30  ;;  %v1164_v26 = vadd.f32 %v3780_v58, %v1040_v38 }
 0x1af   : > { %v1407_v42 = vadd.f32 %v3686_v39, %v1361_v33  ;;  %v801_v63 = vpack.c.bf16 %v759_v37, %v759_v37 }
 0x1b0   : > { %3031 = vmatmul.msk.bf16.gmra.mxu1 %vm922_vm2, %v907_v34 }
 0x1b1   : > { %v1449_v43 = vmax.f32 %v1407_v42, 0.0  ;;  %3056 = vmatmul.msk.bf16.gmra.mxu2 %vm922_vm2, %v907_v34  ;;  %3081 = vmatmul.msk.bf16.gmra.mxu3 %vm922_vm2, %v907_v34  ;;  %v885_v2 = vunpack.c.l.b16 %v801_v63 }
 0x1b3   : > { %v1530_v46 = vsel %vm922_vm2, %v1449_v43, 0.0  ;;  %v1575_v47 = vpack.c.bf16 %v1449_v43, %v1449_v43  ;;  %v908_v14 = vpack.c.b16 %v885_v2, %v884_v52 }
 0x1b4   : > { %v1531_v55 = vadd.f32 %v1530_v46, %v1529_v60  ;;  %v3800_v50 = vpop.f32.mrf.mxu2  ;;  %v1281_v0 = vpop.f32.mrf.mxu3 }
 0x1b5   : > { %v1655_v57 = vunpack.c.l.b16 %v1575_v47  ;;  %v1362_v61 = vadd.f32 %v1281_v0, %v1159_v53  ;;  %v1042_v62 = vpop.f32.mrf.mxu1  ;;  %v713_v53 = vadd.f32 %v3587_v17, %v3647_v44 }
 0x1b6   : > { %v1166_v38 = vadd.f32 %v3789_v35, %v1042_v62 }
 0x1b7   : > { %v1408_v1 = vadd.f32 %v3686_v39, %v1362_v61  ;;  %v3803_v4 = vpack.c.b16 %v1655_v57, %v1654_v54  ;;  %v760_v24 = vmax.f32 %v713_v53, 0.0  ;;  %v3462_v54 = vld [vmem:[%s4337_s2] ss:$0 sm:$0xff] }
 0x1b8   : > { %v718_v57 = vadd.f32 %v3462_v54, %v3674_v15  ;;  %v720_v61 = vadd.f32 %v3462_v54, %v3677_v27 }
 0x1b9   : > { %v1450_v25 = vmax.f32 %v1408_v1, 0.0  ;;  %v802_v33 = vpack.c.bf16 %v760_v24, %v760_v24 }
 0x1ba   : > { %v762_v63 = vmax.f32 %v718_v57, 0.0  ;;  %v763_v1 = vmax.f32 %v720_v61, 0.0 }
 0x1bb   : > { %v1491_v6 = vsel %vm922_vm2, %v1450_v25, 0.0  ;;  %v1576_v13 = vpack.c.bf16 %v1450_v25, %v1450_v25  ;;  %v886_v41 = vunpack.c.l.b16 %v802_v33 }
 0x1bc   : > { %v1492_v7 = vadd.f32 %v1491_v6, %v1490_v11  ;;  %v3806_v60 = vpop.f32.mrf.mxu2  ;;  %v1283_v8 = vpop.f32.mrf.mxu3 }
 0x1bd   : > { %v1363_v9 = vadd.f32 %v1283_v8, %v1161_v21  ;;  %v1045_v16 = vpop.f32.mrf.mxu1  ;;  %v761_v21 = vmax.f32 %v715_v19, 0.0  ;;  %v1656_v30 = vunpack.c.l.b16 %v1576_v13  ;;  %v3406_v19 = vld [vmem:[%s4340_s5 + $0x20] sm:$0xff] }
 0x1be   : > { %v1169_v25 = vadd.f32 %v3800_v50, %v1045_v16  ;;  %v805_v50 = vpack.c.bf16 %v763_v1, %v763_v1  ;;  %1988 = vmatpush.bf16.msra.mxu0 %v3406_v19 }
 0x1bf   : > { %v1409_v20 = vadd.f32 %v3686_v39, %v1363_v9  ;;  %v803_v3 = vpack.c.bf16 %v761_v21, %v761_v21 }
 0x1c0   : > { %3032 = vmatmul.msk.bf16.gmra.mxu1 %vm922_vm2, %v908_v14  ;;  %v889_v21 = vunpack.c.l.b16 %v805_v50 }
 0x1c1   : > { %v1451_v10 = vmax.f32 %v1409_v20, 0.0  ;;  %3057 = vmatmul.msk.bf16.gmra.mxu2 %vm922_vm2, %v908_v14  ;;  %3082 = vmatmul.msk.bf16.gmra.mxu3 %vm922_vm2, %v908_v14  ;;  %v887_v58 = vunpack.c.l.b16 %v803_v3  ;;  %v3407_v14 = vld [vmem:[%s4340_s5 + $0x28] sm:$0xff]  ;;  %v804_v20 = vpack.c.bf16 %v762_v63, %v762_v63 }
 0x1c2   : > { %2051 = vmatpush.bf16.msrb.mxu1 %v3407_v14 }
 0x1c3   : > { %v1532_v44 = vsel %vm922_vm2, %v1451_v10, 0.0  ;;  %v1577_v23 = vpack.c.bf16 %v1451_v10, %v1451_v10  ;;  %v909_v0 = vpack.c.b16 %v887_v58, %v886_v41  ;;  %v888_v24 = vunpack.c.l.b16 %v804_v20 }
 0x1c4   : > { %v1533_v28 = vadd.f32 %v1532_v44, %v1531_v55  ;;  %v3818_v17 = vpop.f32.mrf.mxu2  ;;  %v1286_v51 = vpop.f32.mrf.mxu3 }
 0x1c5   : > { %v1657_v11 = vunpack.c.l.b16 %v1577_v23  ;;  %v1364_v32 = vadd.f32 %v1286_v51, %v1164_v26  ;;  %v1047_v5 = vpop.f32.mrf.mxu1 }
 0x1c6   : > { %v1171_v26 = vadd.f32 %v3806_v60, %v1047_v5 }
 0x1c7   : > { %v1410_v31 = vadd.f32 %v3686_v39, %v1364_v32  ;;  %v3821_v34 = vpack.c.b16 %v1657_v11, %v1656_v30  ;;  %v910_v32 = vpack.c.b16 %v889_v21, %v888_v24 }
 0x1c9   : > { %v1452_v42 = vmax.f32 %v1410_v31, 0.0 }
 0x1cb   : > { %v1493_v43 = vsel %vm922_vm2, %v1452_v42, 0.0  ;;  %v1578_v35 = vpack.c.bf16 %v1452_v42, %v1452_v42 }
 0x1cc   : > { %v1494_v45 = vadd.f32 %v1493_v43, %v1492_v7  ;;  %v1175_v37 = vpop.f32.mrf.mxu2  ;;  %v1288_v46 = vpop.f32.mrf.mxu3 }
 0x1cd   : > { %v1365_v47 = vadd.f32 %v1288_v46, %v1166_v38  ;;  %v1050_v55 = vpop.f32.mrf.mxu1  ;;  %v1658_v7 = vunpack.c.l.b16 %v1578_v35 }
 0x1ce   : > { %v1174_v60 = vadd.f32 %v3818_v17, %v1050_v55 }
 0x1cf   : > { %v1411_v29 = vadd.f32 %v3686_v39, %v1365_v47 }
 0x1d0   : > { %3033 = vmatmul.msk.bf16.gmra.mxu1 %vm922_vm2, %v909_v0 }
 0x1d1   : > { %v1453_v62 = vmax.f32 %v1411_v29, 0.0  ;;  %3058 = vmatmul.msk.bf16.gmra.mxu2 %vm922_vm2, %v909_v0  ;;  %3083 = vmatmul.msk.bf16.gmra.mxu3 %vm922_vm2, %v909_v0 }
 0x1d3   : > { %v1534_v52 = vsel %vm922_vm2, %v1453_v62, 0.0  ;;  %v1579_v2 = vpack.c.bf16 %v1453_v62, %v1453_v62 }
 0x1d4   : > { %v1535_v15 = vadd.f32 %v1534_v52, %v1533_v28  ;;  %v1178_v6 = vpop.f32.mrf.mxu2  ;;  %v1291_v27 = vpop.f32.mrf.mxu3 }
 0x1d5   : > { %v1659_v8 = vunpack.c.l.b16 %v1579_v2  ;;  %v1366_v9 = vadd.f32 %v1291_v27, %v1169_v25  ;;  %v1052_v53 = vpop.f32.mrf.mxu1 }
 0x1d6   : > { %v1176_v46 = vadd.f32 %v1175_v37, %v1052_v53 }
 0x1d7   : > { %v1412_v16 = vadd.f32 %v3686_v39, %v1366_v9  ;;  %v3843_v13 = vpack.c.b16 %v1659_v8, %v1658_v7 }
 0x1d9   : > { %v3845_v10 = vmax.f32 %v1412_v16, 0.0  ;;  %3094 = vmatmul.msk.bf16.gmra.mxu0 %vm922_vm2, %v3843_v13 }
 0x1db   : > { %v1495_v44 = vsel %vm922_vm2, %v3845_v10, 0.0 }
 0x1dc   : > { %v1496_v23 = vadd.f32 %v1495_v44, %v1494_v45  ;;  %v1180_v28 = vpop.f32.mrf.mxu2  ;;  %v1293_v51 = vpop.f32.mrf.mxu3 }
 0x1dd   : > { %v1367_v30 = vadd.f32 %v1293_v51, %v1171_v26  ;;  %v1055_v11 = vpop.f32.mrf.mxu1 }
 0x1de   : > { %v1179_v61 = vadd.f32 %v1178_v6, %v1055_v11 }
 0x1df   : > { %v1413_v33 = vadd.f32 %v3686_v39, %v1367_v30 }
 0x1e0   : > { %3034 = vmatmul.msk.bf16.gmra.mxu1 %vm922_vm2, %v910_v32 }
 0x1e1   : > { %v3854_v3 = vmax.f32 %v1413_v33, 0.0  ;;  %3084 = vmatmul.msk.bf16.gmra.mxu3 %vm922_vm2, %v910_v32  ;;  %3112 = vmatmul.msk.bf16.vlgmr.msra.gmra.mxu2 %vm922_vm2, %v1681_v56 }
 0x1e3   : > { %v1536_v5 = vsel %vm922_vm2, %v3854_v3, 0.0  ;;  %v1581_v33 = vpack.c.bf16 %v3854_v3, %v3854_v3 }
 0x1e4   : > { %v1537_v31 = vadd.f32 %v1536_v5, %v1535_v15  ;;  %v1183_v42 = vpop.f32.mrf.mxu2  ;;  %v1296_v41 = vpop.f32.mrf.mxu3 }
 0x1e5   : > { %v1368_v58 = vadd.f32 %v1296_v41, %v1174_v60  ;;  %v1057_v38 = vpop.f32.mrf.mxu1 }
 0x1e6   : > { %v1181_v8 = vadd.f32 %v1180_v28, %v1057_v38 }
 0x1e7   : > { %v1414_v43 = vadd.f32 %v3686_v39, %v1368_v58 }
 0x1e9   : > { %v1456_v45 = vmax.f32 %v1414_v43, 0.0 }
 0x1eb   : > { %v1497_v47 = vsel %vm922_vm2, %v1456_v45, 0.0  ;;  %v1582_v55 = vpack.c.bf16 %v1456_v45, %v1456_v45 }
 0x1ec   : > { %v1498_v0 = vadd.f32 %v1497_v47, %v1496_v23  ;;  %v1298_v48 = vpop.f32.mrf.mxu3  ;;  %v1185_v54 = vpop.f32.mrf.mxu2 }
 0x1ed   : > { %v1369_v49 = vadd.f32 %v1298_v48, %v1176_v46  ;;  %v1060_v56 = vpop.f32.mrf.mxu1  ;;  %v1662_v63 = vunpack.c.l.b16 %v1582_v55 }
 0x1ee   : > { %v1184_v21 = vadd.f32 %v1183_v42, %v1060_v56  ;;  %v1661_v42 = vunpack.c.l.b16 %v1581_v33 }
 0x1ef   : > { %v1415_v17 = vadd.f32 %v3686_v39, %v1369_v49 }
 0x1f0   : > { %1797 = vmatmul.bf16.vlgmr.msra.gmra.mxu1 %v3472_v12 }
 0x1f1   : > { %v1457_v57 = vmax.f32 %v1415_v17, 0.0  ;;  %1340 = vmatmul.bf16.gmra.mxu3 %v3472_v12  ;;  %3113 = vmatmul.msk.bf16.gmra.mxu2 %vm922_vm2, %v3758_v59 }
 0x1f3   : > { %v1538_v37 = vsel %vm922_vm2, %v1457_v57, 0.0  ;;  %v1583_v29 = vpack.c.bf16 %v1457_v57, %v1457_v57 }
 0x1f4   : > { %v1539_v35 = vadd.f32 %v1538_v37, %v1537_v31  ;;  %v1301_v62 = vpop.f32.mrf.mxu3  ;;  %v3875_v27 = vpop.f32.mrf.mxu2 }
 0x1f5   : > { %v1663_v1 = vunpack.c.l.b16 %v1583_v29  ;;  %v1370_v25 = vadd.f32 %v1301_v62, %v1179_v61  ;;  %v1062_v52 = vpop.f32.mrf.mxu1 }
 0x1f6   : > { %v1186_v41 = vadd.f32 %v1185_v54, %v1062_v52 }
 0x1f7   : > { %v1416_v2 = vadd.f32 %v3686_v39, %v1370_v25  ;;  %v3873_v15 = vpack.c.b16 %v1663_v1, %v1662_v63 }
 0x1f9   : > { %v1458_v7 = vmax.f32 %v1416_v2, 0.0 }
 0x1fb   : > { %v1499_v9 = vsel %vm922_vm2, %v1458_v7, 0.0  ;;  %v1584_v50 = vpack.c.bf16 %v1458_v7, %v1458_v7 }
 0x1fc   : > { %v1500_v6 = vadd.f32 %v1499_v9, %v1498_v0  ;;  %v1303_v53 = vpop.f32.mrf.mxu3  ;;  %v1190_v24 = vpop.f32.mrf.mxu2 }
 0x1fd   : > { %v1371_v19 = vadd.f32 %v1303_v53, %v1181_v8  ;;  %v1065_v14 = vpop.f32.mrf.mxu1  ;;  %v1664_v51 = vunpack.c.l.b16 %v1584_v50 }
 0x1fe   : > { %v1189_v53 = vadd.f32 %v3875_v27, %v1065_v14 }
 0x1ff   : > { %v1417_v20 = vadd.f32 %v3686_v39, %v1371_v19 }
 0x200   : > { %3101 = vmatmul.msk.bf16.gmra.mxu1 %vm922_vm2, %v3729_v36 }
 0x201   : > { %v1459_v16 = vmax.f32 %v1417_v20, 0.0  ;;  %3114 = vmatmul.msk.bf16.gmra.mxu2 %vm922_vm2, %v3803_v4  ;;  %3124 = vmatmul.msk.bf16.vlgmr.msra.gmra.mxu3 %vm922_vm2, %v3729_v36  ;;  %v1580_v36 = vpack.c.bf16 %v3845_v10, %v3845_v10 }
 0x203   : > { %v1540_v26 = vsel %vm922_vm2, %v1459_v16, 0.0  ;;  %v1585_v44 = vpack.c.bf16 %v1459_v16, %v1459_v16  ;;  %v1660_v3 = vunpack.c.l.b16 %v1580_v36 }
 0x204   : > { %v1541_v23 = vadd.f32 %v1540_v26, %v1539_v35  ;;  %v1306_v28 = vpop.f32.mrf.mxu3  ;;  %v1193_v38 = vpop.f32.mrf.mxu2 }
 0x205   : > { %v1665_v30 = vunpack.c.l.b16 %v1585_v44  ;;  %v1372_v11 = vadd.f32 %v1306_v28, %v1184_v21  ;;  %v1067_v32 = vpop.f32.mrf.mxu1  ;;  %v3899_v48 = vpack.c.b16 %v1661_v42, %v1660_v3  ;;  %v3942_v3 = vld [vmem:[%s4339_s4] ss:$0 sm:$0xff] }
 0x206   : > { %v1191_v25 = vadd.f32 %v1190_v24, %v1067_v32 }
 0x207   : > { %v1418_v60 = vadd.f32 %v3686_v39, %v1372_v11  ;;  %v3889_v5 = vpack.c.b16 %v1665_v30, %v1664_v51 }
 0x209   : > { %v1460_v31 = vmax.f32 %v1418_v60, 0.0  ;;  %3095 = vmatmul.msk.bf16.gmra.mxu0 %vm922_vm2, %v3889_v5 }
 0x20b   : > { %v1501_v58 = vsel %vm922_vm2, %v1460_v31, 0.0  ;;  %v1586_v61 = vpack.c.bf16 %v1460_v31, %v1460_v31 }
 0x20c   : > { %v3896_v43 = vadd.f32 %v1501_v58, %v1500_v6  ;;  %v1308_v45 = vpop.f32.mrf.mxu3  ;;  %v1195_v55 = vpop.f32.mrf.mxu2 }
 0x20d   : > { %v1373_v46 = vadd.f32 %v1308_v45, %v1186_v41  ;;  %v1070_v47 = vpop.f32.mrf.mxu1  ;;  %v1666_v35 = vunpack.c.l.b16 %v1586_v61 }
 0x20f   : > { %v1419_v0 = vadd.f32 %v3686_v39, %v1373_v46 }
 0x210   : > { %3102 = vmatmul.msk.bf16.gmra.mxu1 %vm922_vm2, %v3770_v40 }
 0x211   : > { %v1461_v10 = vmax.f32 %v1419_v0, 0.0  ;;  %3115 = vmatmul.msk.bf16.gmra.mxu2 %vm922_vm2, %v3899_v48  ;;  %3125 = vmatmul.msk.bf16.gmra.mxu3 %vm922_vm2, %v3770_v40  ;;  %v1194_v40 = vadd.f32 %v1193_v38, %v1070_v47 }
 0x213   : > { %v1542_v49 = vsel %vm922_vm2, %v1461_v10, 0.0  ;;  %v1587_v57 = vpack.c.bf16 %v1461_v10, %v1461_v10 }
 0x214   : > { %v1543_v56 = vadd.f32 %v1542_v49, %v1541_v23  ;;  %v1311_v54 = vpop.f32.mrf.mxu3  ;;  %v1198_v1 = vpop.f32.mrf.mxu2 }
 0x215   : > { %v1072_v17 = vpop.f32.mrf.mxu1  ;;  %v1667_v37 = vunpack.c.l.b16 %v1587_v57  ;;  %v1374_v16 = vadd.f32 %v1311_v54, %v1189_v53 }
 0x216   : > { %v1196_v20 = vadd.f32 %v1195_v55, %v1072_v17 }
 0x217   : > { %v3908_v63 = vpack.c.b16 %v1667_v37, %v1666_v35  ;;  %v1420_v28 = vadd.f32 %v3686_v39, %v1374_v16 }
 0x219   : > { %v3931_v33 = vmax.f32 %v1420_v28, 0.0 }
 0x21c   : > { %v1313_v29 = vpop.f32.mrf.mxu3  ;;  %v1200_v19 = vpop.f32.mrf.mxu2 }
 0x21d   : > { %v1075_v62 = vpop.f32.mrf.mxu1  ;;  %v1375_v52 = vadd.f32 %v1313_v29, %v1191_v25 }
 0x21e   : > { %v1199_v30 = vadd.f32 %v1198_v1, %v1075_v62 }
 0x21f   : > { %v1421_v9 = vadd.f32 %v3686_v39, %v1375_v52 }
 0x220   : > { %3103 = vmatmul.msk.bf16.gmra.mxu1 %vm922_vm2, %v3821_v34 }
 0x221   : > { %3116 = vmatmul.msk.bf16.gmra.mxu2 %vm922_vm2, %v3908_v63  ;;  %3126 = vmatmul.msk.bf16.gmra.mxu3 %vm922_vm2, %v3821_v34  ;;  %v1463_v50 = vmax.f32 %v1421_v9, 0.0 }
 0x223   : > { %v1544_v44 = vsel %vm922_vm2, %v1463_v50, 0.0  ;;  %v1589_v38 = vpack.c.bf16 %v1463_v50, %v1463_v50 }
 0x224   : > { %v1316_v2 = vpop.f32.mrf.mxu3  ;;  %v1545_v51 = vadd.f32 %v1544_v44, %v1543_v56  ;;  %v1203_v60 = vpop.f32.mrf.mxu2 }
 0x225   : > { %v1376_v7 = vadd.f32 %v1316_v2, %v1194_v40  ;;  %v1077_v8 = vpop.f32.mrf.mxu1  ;;  %v1669_v47 = vunpack.c.l.b16 %v1589_v38  ;;  %v3411_v38 = vld [vmem:[%s4342_s7 + $0x18] sm:$0xff] }
 0x226   : > { %v1201_v0 = vadd.f32 %v1200_v19, %v1077_v8  ;;  %2318 = vmatpush.bf16.msrb.mxu3 %v3411_v38 }
 0x227   : > { %v1422_v6 = vadd.f32 %v3686_v39, %v1376_v7 }
 0x229   : > { %v3919_v21 = vmax.f32 %v1422_v6, 0.0 }
 0x22b   : > { %v1590_v27 = vpack.c.bf16 %v3919_v21, %v3919_v21 }
 0x22c   : > { %v1318_v24 = vpop.f32.mrf.mxu3  ;;  %v1205_v55 = vpop.f32.mrf.mxu2 }
 0x22d   : > { %v1377_v26 = vadd.f32 %v1318_v24, %v1196_v20  ;;  %v1080_v34 = vpop.f32.mrf.mxu1  ;;  %v1670_v31 = vunpack.c.l.b16 %v1590_v27 }
 0x22e   : > { %v1204_v35 = vadd.f32 %v1203_v60, %v1080_v34 }
 0x22f   : > { %v1423_v23 = vadd.f32 %v3686_v39, %v1377_v26 }
 0x230   : > { %3104 = vmatmul.msk.bf16.gmra.mxu1 %vm922_vm2, %v3873_v15 }
 0x231   : > { %v1465_v14 = vmax.f32 %v1423_v23, 0.0  ;;  %3127 = vmatmul.msk.bf16.gmra.mxu3 %vm922_vm2, %v3873_v15  ;;  %v1588_v15 = vpack.c.bf16 %v3931_v33, %v3931_v33 }
 0x233   : > { %v1546_v11 = vsel %vm922_vm2, %v1465_v14, 0.0  ;;  %v1591_v32 = vpack.c.bf16 %v1465_v14, %v1465_v14  ;;  %v1668_v10 = vunpack.c.l.b16 %v1588_v15 }
 0x234   : > { %v3933_v36 = vadd.f32 %v1546_v11, %v1545_v51  ;;  %v1321_v39 = vpop.f32.mrf.mxu3  ;;  %v1208_v8 = vpop.f32.mrf.mxu2 }
 0x235   : > { %v1671_v42 = vunpack.c.l.b16 %v1591_v32  ;;  %v1378_v41 = vadd.f32 %v1321_v39, %v1199_v30  ;;  %v1082_v58 = vpop.f32.mrf.mxu1  ;;  %v1694_v57 = vpack.c.b16 %v1669_v47, %v1668_v10  ;;  %v3975_v51 = vpop.f32.mrf.mxu0  ;;  %v1505_v10 = vsel %vm922_vm2, %v3919_v21, 0.0 }
 0x236   : > { %v1206_v6 = vadd.f32 %v1205_v55, %v1082_v58 }
 0x237   : > { %v3935_v45 = vpack.c.b16 %v1671_v42, %v1670_v31  ;;  %v1424_v46 = vadd.f32 %v3942_v3, %v1378_v41 }
 0x239   : > { %3096 = vmatmul.msk.bf16.gmra.mxu0 %vm922_vm2, %v3935_v45  ;;  %v3947_v56 = vmax.f32 %v1424_v46, 0.0  ;;  %v1503_v46 = vsel %vm922_vm2, %v3931_v33, 0.0  ;;  %v3419_v33 = vld [vmem:[%s4342_s7 + $0x58] sm:$0xff] }
 0x23a   : > { %2390 = vmatpush.bf16.msrb.mxu0 %v3419_v33 }
 0x23b   : > { %v1592_v37 = vpack.c.bf16 %v3947_v56, %v3947_v56 }
 0x23c   : > { %v1323_v49 = vpop.f32.mrf.mxu3  ;;  %v1210_v34 = vpop.f32.mrf.mxu2 }
 0x23d   : > { %v1379_v54 = vadd.f32 %v1323_v49, %v1201_v0  ;;  %v1085_v17 = vpop.f32.mrf.mxu1  ;;  %v1672_v25 = vunpack.c.l.b16 %v1592_v37  ;;  %v3979_v39 = vpop.f32.mrf.mxu0 }
 0x23e   : > { %v1209_v42 = vadd.f32 %v1208_v8, %v1085_v17  ;;  %v1504_v17 = vadd.f32 %v1503_v46, %v3896_v43 }
 0x23f   : > { %v1425_v61 = vadd.f32 %v3942_v3, %v1379_v54 }
 0x240   : > { %3105 = vmatmul.msk.bf16.gmra.mxu1 %vm922_vm2, %v1694_v57 }
 0x241   : > { %v3953_v29 = vmax.f32 %v1425_v61, 0.0  ;;  %3128 = vmatmul.msk.bf16.gmra.mxu3 %vm922_vm2, %v1694_v57  ;;  %v1507_v57 = vsel %vm922_vm2, %v3947_v56, 0.0 }
 0x243   : > { %v1593_v62 = vpack.c.bf16 %v3953_v29, %v3953_v29 }
 0x244   : > { %v1326_v1 = vpop.f32.mrf.mxu3 }
 0x245   : > { %v1673_v40 = vunpack.c.l.b16 %v1593_v62  ;;  %v1380_v52 = vadd.f32 %v1326_v1, %v1204_v35  ;;  %v1087_v2 = vpop.f32.mrf.mxu1  ;;  %v1506_v35 = vadd.f32 %v1505_v10, %v1504_v17 }
 0x246   : > { %v1211_v49 = vadd.f32 %v1210_v34, %v1087_v2 }
 0x247   : > { %v3958_v7 = vpack.c.b16 %v1673_v40, %v1672_v25  ;;  %v1426_v9 = vadd.f32 %v3942_v3, %v1380_v52  ;;  %v1508_v25 = vadd.f32 %v1507_v57, %v1506_v35 }
 0x249   : > { %3117 = vmatmul.msk.bf16.gmra.mxu2 %vm922_vm2, %v3958_v7  ;;  %3136 = vmatmul.msk.bf16.vlgmr.msra.gmra.mxu0 %vm922_vm2, %v3743_v18  ;;  %v1468_v19 = vmax.f32 %v1426_v9, 0.0 }
 0x24b   : > { %v1594_v24 = vpack.c.bf16 %v1468_v19, %v1468_v19  ;;  %v1509_v62 = vsel %vm922_vm2, %v1468_v19, 0.0 }
 0x24c   : > { %v1328_v53 = vpop.f32.mrf.mxu3  ;;  %v1510_v9 = vadd.f32 %v1509_v62, %v1508_v25 }
 0x24d   : > { %v1381_v20 = vadd.f32 %v1328_v53, %v1206_v6  ;;  %v1090_v50 = vpop.f32.mrf.mxu1  ;;  %v1674_v28 = vunpack.c.l.b16 %v1594_v24 }
 0x24f   : > { %v1427_v16 = vadd.f32 %v3942_v3, %v1381_v20 }
 0x250   : > { %3148 = vmatmul.msk.bf16.vlgmr.msrb.gmra.mxu1 %vm922_vm2, %v3758_v59  ;;  %v1213_v59 = vpop.f32.mrf.mxu2 }
 0x251   : > { %v3968_v26 = vmax.f32 %v1427_v16, 0.0  ;;  %v1214_v41 = vadd.f32 %v1213_v59, %v1090_v50  ;;  %v1548_v16 = vsel %vm922_vm2, %v3953_v29, 0.0 }
 0x253   : > { %v1595_v44 = vpack.c.bf16 %v3968_v26, %v3968_v26 }
 0x254   : > { %v1331_v23 = vpop.f32.mrf.mxu3 }
 0x255   : > { %v1675_v18 = vunpack.c.l.b16 %v1595_v44  ;;  %v1092_v27 = vpop.f32.mrf.mxu1  ;;  %v1382_v58 = vadd.f32 %v1331_v23, %v1209_v42 }
 0x257   : > { %v1697_v14 = vpack.c.b16 %v1675_v18, %v1674_v28  ;;  %v1428_v47 = vadd.f32 %v3942_v3, %v1382_v58  ;;  %v1550_v28 = vsel %vm922_vm2, %v3968_v26, 0.0  ;;  %v3410_v58 = vld [vmem:[%s4342_s7 + $0x10] sm:$0xff] }
 0x258   : > { %v1215_v31 = vpop.f32.mrf.mxu2  ;;  %2319 = vmatpush.bf16.msrb.mxu3 %v3410_v58 }
 0x259   : > { %3129 = vmatmul.msk.bf16.gmra.mxu3 %vm922_vm2, %v1697_v14  ;;  %3137 = vmatmul.msk.bf16.gmra.mxu0 %vm922_vm2, %v3784_v22  ;;  %v3415_v22 = vld [vmem:[%s4342_s7 + $0x38] sm:$0xff]  ;;  %v4007_v61 = vmax.f32 %v1428_v47, 0.0  ;;  %v1216_v37 = vadd.f32 %v1215_v31, %v1092_v27  ;;  %v1549_v14 = vadd.f32 %v1548_v16, %v3933_v36  ;;  %v3414_v36 = vld [vmem:[%s4342_s7 + $0x30] sm:$0xff] }
 0x25a   : > { %2253 = vmatpush.bf16.msrb.mxu2 %v3415_v22 }
 0x25b   : > { %v1511_v52 = vsel %vm922_vm2, %v4007_v61, 0.0  ;;  %v1551_v26 = vadd.f32 %v1550_v28, %v1549_v14 }
 0x25c   : > { %v1333_v30 = vpop.f32.mrf.mxu3  ;;  %v1512_v50 = vadd.f32 %v1511_v52, %v1510_v9 }
 0x25d   : > { %v1095_v11 = vpop.f32.mrf.mxu1  ;;  %v1383_v21 = vadd.f32 %v1333_v30, %v1211_v49  ;;  %v1596_v49 = vpack.c.bf16 %v4007_v61, %v4007_v61 }
 0x25e   : > { %2254 = vmatpush.bf16.msrb.mxu2 %v3414_v36 }
 0x25f   : > { %v1429_v56 = vadd.f32 %v3942_v3, %v1383_v21 }
 0x260   : > { %3149 = vmatmul.msk.bf16.gmra.mxu1 %vm922_vm2, %v3803_v4  ;;  %v1218_v55 = vpop.f32.mrf.mxu2 }
 0x261   : > { %v1219_v43 = vadd.f32 %v1218_v55, %v1095_v11  ;;  %v1471_v24 = vmax.f32 %v1429_v56, 0.0  ;;  %v1676_v55 = vunpack.c.l.b16 %v1596_v49 }
 0x263   : > { %v1597_v10 = vpack.c.bf16 %v1471_v24, %v1471_v24 }
 0x264   : > { %v1336_v32 = vpop.f32.mrf.mxu3 }
 0x265   : > { %v1097_v60 = vpop.f32.mrf.mxu1  ;;  %v1384_v4 = vadd.f32 %v1336_v32, %v1214_v41  ;;  %v1677_v17 = vunpack.c.l.b16 %v1597_v10 }
 0x267   : > { %v1430_v54 = vadd.f32 %v3942_v3, %v1384_v4  ;;  %v1698_v21 = vpack.c.b16 %v1677_v17, %v1676_v55 }
 0x268   : > { %v1220_v44 = vpop.f32.mrf.mxu2 }
 0x269   : > { %3138 = vmatmul.msk.bf16.gmra.mxu0 %vm922_vm2, %v3843_v13  ;;  %v3994_v13 = vpop.f32.mrf.mxu0  ;;  %v4010_v1 = vmax.f32 %v1430_v54, 0.0  ;;  %v1221_v18 = vadd.f32 %v1220_v44, %v1097_v60 }
 0x26b   : > { %v1513_v6 = vsel %vm922_vm2, %v4010_v1, 0.0 }
 0x26c   : > { %v1338_v15 = vpop.f32.mrf.mxu3  ;;  %v1514_v23 = vadd.f32 %v1513_v6, %v1512_v50  ;;  %v3408_v6 = vld [vmem:[%s4342_s7] sm:$0xff] }
 0x26d   : > { %v3992_v0 = vpop.f32.mrf.mxu1 }
 0x270   : > { %3150 = vmatmul.msk.bf16.gmra.mxu1 %vm922_vm2, %v3899_v48  ;;  %v1385_v48 = vadd.f32 %v1338_v15, %v1216_v37  ;;  %v3409_v37 = vld [vmem:[%s4342_s7 + $0x8] sm:$0xff] }
 0x271   : > { %v4021_v20 = vpop.f32.mrf.mxu0  ;;  %2320 = vmatpush.bf16.msrb.mxu3 %v3409_v37 }
 0x272   : > { %v1431_v53 = vadd.f32 %v3942_v3, %v1385_v48 }
 0x274   : > { %v1341_v40 = vpop.f32.mrf.mxu3  ;;  %v1473_v27 = vmax.f32 %v1431_v53, 0.0  ;;  %v1864_v53 = vpop.f32.mrf.mxu2 }
 0x275   : > { %v1386_v2 = vadd.f32 %v1341_v40, %v1219_v43  ;;  %v4015_v8 = vpop.f32.mrf.mxu1  ;;  %v3417_v40 = vld [vmem:[%s4342_s7 + $0x48] sm:$0xff]  ;;  %2321 = vmatpush.bf16.msrb.mxu3 %v3408_v6 }
 0x276   : > { %v1554_v60 = vsel %vm922_vm2, %v1473_v27, 0.0  ;;  %v1599_v57 = vpack.c.bf16 %v1473_v27, %v1473_v27  ;;  %v3416_v27 = vld [vmem:[%s4342_s7 + $0x40] sm:$0xff] }
 0x277   : > { %v1432_v19 = vadd.f32 %v3942_v3, %v1386_v2 }
 0x278   : > { %v1679_v61 = vunpack.c.l.b16 %v1599_v57  ;;  %2322 = vmatmul.bf16.vlgmr.msrb.gmra.mxu3 %v3472_v12 }
 0x279   : > { %v1474_v34 = vmax.f32 %v1432_v19, 0.0  ;;  %3139 = vmatmul.msk.bf16.gmra.mxu0 %vm922_vm2, %v3889_v5  ;;  %v1552_v5 = vsel %vm922_vm2, %v1471_v24, 0.0  ;;  %v4044_v42 = vpop.f32.mrf.mxu0  ;;  %v3412_v24 = vld [vmem:[%s4342_s7 + $0x20] sm:$0xff] }
 0x27a   : > { %v1553_v41 = vadd.f32 %v1552_v5, %v1551_v26 }
 0x27b   : > { %v1515_v29 = vsel %vm922_vm2, %v1474_v34, 0.0 }
 0x27c   : > { %v1516_v59 = vadd.f32 %v1515_v29, %v1514_v23  ;;  %v1343_v30 = vpop.f32.mrf.mxu3  ;;  %v1555_v38 = vadd.f32 %v1554_v60, %v1553_v41  ;;  %v1866_v34 = vpop.f32.mrf.mxu2  ;;  %v1799_v29 = vadd.f32 %v3992_v0, %v3975_v51  ;;  %v1801_v60 = vadd.f32 %v4015_v8, %v3979_v39 }
 0x27d   : > { %v1387_v11 = vadd.f32 %v1343_v30, %v1221_v18  ;;  %v4038_v32 = vpop.f32.mrf.mxu1 }
 0x27e   : > { %1558 = vst.msk [vmem:[%s4033_s26] sm:$0xff] %vm922_vm2, %v1516_v59  ;;  %v1895_v0 = vadd.f32 %v1866_v34, %v1801_v60 }
 0x27f   : > { %v1433_v31 = vadd.f32 %v3942_v3, %v1387_v11  ;;  %v1894_v11 = vadd.f32 %v1864_v53, %v1799_v29 }
 0x280   : > { %3151 = vmatmul.msk.bf16.gmra.mxu1 %vm922_vm2, %v3908_v63  ;;  %v3418_v63 = vld [vmem:[%s4342_s7 + $0x50] sm:$0xff] }
 0x281   : > { %v1475_v22 = vmax.f32 %v1433_v31, 0.0  ;;  %2391 = vmatpush.bf16.msrb.mxu0 %v3418_v63  ;;  %v4064_v46 = vpop.f32.mrf.mxu0  ;;  %v1804_v63 = vadd.f32 %v4038_v32, %v3994_v13 }
 0x283   : > { %v1556_v3 = vsel %vm922_vm2, %v1475_v22, 0.0  ;;  %v4122_v22 = vld [vmem:[%s4341_s6] ss:$0 sm:$0xff] }
 0x284   : > { %v1557_v4 = vadd.f32 %v1556_v3, %v1555_v38  ;;  %v1927_v19 = vpop.f32.mrf.mxu3  ;;  %v1869_v14 = vpop.f32.mrf.mxu2 }
 0x285   : > { %v4055_v15 = vpop.f32.mrf.mxu1  ;;  %2392 = vmatpush.bf16.msrb.mxu0 %v3417_v40  ;;  %v1957_v26 = vadd.f32 %v1927_v19, %v1894_v11  ;;  %v1896_v17 = vadd.f32 %v1869_v14, %v1804_v63 }
 0x286   : > { %1559 = vst.msk [vmem:[%s4033_s26 + $0x20] sm:$0xff] %vm922_vm2, %v1557_v4 }
 0x289   : > { %3140 = vmatmul.msk.bf16.gmra.mxu0 %vm922_vm2, %v3935_v45  ;;  %v1753_v54 = vpop.f32.mrf.mxu0  ;;  %v3413_v45 = vld [vmem:[%s4342_s7 + $0x28] sm:$0xff] }
 0x28a   : > { %2255 = vmatpush.bf16.msrb.mxu2 %v3413_v45  ;;  %2393 = vmatpush.bf16.msrb.mxu0 %v3416_v27 }
 0x28c   : > { %v1929_v44 = vpop.f32.mrf.mxu3  ;;  %v1871_v51 = vpop.f32.mrf.mxu2 }
 0x28d   : > { %v4066_v47 = vpop.f32.mrf.mxu1  ;;  %v1958_v3 = vadd.f32 %v1929_v44, %v1895_v0 }
 0x28e   : > { %2256 = vmatpush.bf16.msrb.mxu2 %v3412_v24 }
 0x290   : > { %3152 = vmatmul.msk.bf16.gmra.mxu1 %vm922_vm2, %v3958_v7  ;;  %v1598_v7 = vpack.c.bf16 %v4010_v1, %v4010_v1 }
 0x291   : > { %v4083_v35 = vpop.f32.mrf.mxu0 }
 0x292   : > { %v1678_v62 = vunpack.c.l.b16 %v1598_v7 }
 0x294   : > { %v1699_v25 = vpack.c.b16 %v1679_v61, %v1678_v62  ;;  %v1932_v5 = vpop.f32.mrf.mxu3  ;;  %v1874_v57 = vpop.f32.mrf.mxu2  ;;  %v1806_v61 = vadd.f32 %v4055_v15, %v4021_v20  ;;  %v1809_v15 = vadd.f32 %v4066_v47, %v4044_v42 }
 0x295   : > { %v4072_v33 = vpop.f32.mrf.mxu1  ;;  %v1959_v45 = vadd.f32 %v1932_v5, %v1896_v17 }
 0x296   : > { %v1898_v5 = vadd.f32 %v1874_v57, %v1809_v15 }
 0x299   : > { %3141 = vmatmul.msk.bf16.gmra.mxu0 %vm922_vm2, %v1698_v21  ;;  %v1758_v1 = vpop.f32.mrf.mxu0 }
 0x29c   : > { %v1934_v38 = vpop.f32.mrf.mxu3  ;;  %v1876_v20 = vpop.f32.mrf.mxu2 }
 0x29d   : > { %v1813_v43 = vpop.f32.mrf.mxu1 }
 0x29e   : > { %v4085_v48 = vadd.f32 %v1813_v43, %v1753_v54 }
 0x2a0   : > { %3153 = vmatmul.msk.bf16.gmra.mxu1 %vm922_vm2, %v1699_v25 }
 0x2a1   : > { %v4093_v2 = vpop.f32.mrf.mxu0 }
 0x2a4   : > { %v1937_v7 = vpop.f32.mrf.mxu3 }
 0x2a5   : > { %v4091_v52 = vpop.f32.mrf.mxu1 }
 0x2ad   : > { %v1818_v56 = vpop.f32.mrf.mxu1 }
 0x2ae   : > { %v4095_v9 = vadd.f32 %v1818_v56, %v1758_v1  ;;  %v1897_v56 = vadd.f32 %v1871_v51, %v1806_v61 }
 0x2b0   : > { %v1960_v19 = vadd.f32 %v1934_v38, %v1897_v56 }
 0x2b5   : > { %v4101_v50 = vpop.f32.mrf.mxu1 }
 0x2b6   : > { %v1763_v16 = vpop.f32.mrf.mxu0 }
 0x2bd   : > { %v1823_v23 = vpop.f32.mrf.mxu1 }
 0x2be   : > { %v4106_v28 = vpop.f32.mrf.mxu0  ;;  %v4108_v18 = vadd.f32 %v1823_v23, %v1763_v16  ;;  %v1939_v23 = vpop.f32.mrf.mxu3 }
 0x2c5   : > { %v4115_v59 = vpop.f32.mrf.mxu1 }
 0x2c6   : > { %v1990_v30 = vpop.f32.mrf.mxu0 }
 0x2c7   : > { %v2020_v31 = vadd.f32 %v1990_v30, %v1957_v26  ;;  %v1961_v26 = vadd.f32 %v1937_v7, %v1898_v5 }
 0x2cd   : > { %v2053_v41 = vpop.f32.mrf.mxu1 }
 0x2ce   : > { %v1992_v36 = vpop.f32.mrf.mxu0  ;;  %v2083_v58 = vadd.f32 %v2053_v41, %v2020_v31  ;;  %v1811_v41 = vadd.f32 %v4072_v33, %v4064_v46 }
 0x2cf   : > { %v2021_v10 = vadd.f32 %v1992_v36, %v1958_v3  ;;  %v1879_v36 = vpop.f32.mrf.mxu2 }
 0x2d0   : > { %v2099_v4 = vadd.f32 %v4122_v22, %v2083_v58  ;;  %v1899_v63 = vadd.f32 %v1876_v20, %v1811_v41 }
 0x2d2   : > { %v2111_v8 = vmax.f32 %v2099_v4, 0.0  ;;  %v1942_v4 = vpop.f32.mrf.mxu3 }
 0x2d4   : > { %v2148_v37 = vpack.c.bf16 %v2111_v8, %v2111_v8  ;;  %v2124_v24 = vsel %vm2123_vm3, %v2111_v8, 0.0  ;;  %v1962_v8 = vadd.f32 %v1939_v23, %v1899_v63 }
 0x2d5   : > { %v2055_v39 = vpop.f32.mrf.mxu1 }
 0x2d6   : > { %v1995_v49 = vpop.f32.mrf.mxu0  ;;  %v2084_v54 = vadd.f32 %v2055_v39, %v2021_v10  ;;  %v2172_v43 = vunpack.c.l.b16 %v2148_v37  ;;  %v1900_v37 = vadd.f32 %v1879_v36, %v4085_v48 }
 0x2d7   : > { %v2022_v62 = vadd.f32 %v1995_v49, %v1959_v45  ;;  %v1881_v45 = vpop.f32.mrf.mxu2 }
 0x2d8   : > { %v2100_v55 = vadd.f32 %v4122_v22, %v2084_v54 }
 0x2da   : > { %v4128_v21 = vmax.f32 %v2100_v55, 0.0 }
 0x2dc   : > { %v2149_v13 = vpack.c.bf16 %v4128_v21, %v4128_v21 }
 0x2dd   : > { %v2058_v32 = vpop.f32.mrf.mxu1 }
 0x2de   : > { %v2173_v25 = vunpack.c.l.b16 %v2149_v13  ;;  %v1997_v40 = vpop.f32.mrf.mxu0  ;;  %v2085_v1 = vadd.f32 %v2058_v32, %v2022_v62  ;;  %v1944_v62 = vpop.f32.mrf.mxu3  ;;  %v1963_v13 = vadd.f32 %v1942_v4, %v1900_v37  ;;  %v2135_v32 = vsel %vm2123_vm3, %v4128_v21, 0.0 }
 0x2df   : > { %v2023_v34 = vadd.f32 %v1997_v40, %v1960_v19  ;;  %v1884_v23 = vpop.f32.mrf.mxu2 }
 0x2e0   : > { %v2184_v6 = vpack.c.b16 %v2173_v25, %v2172_v43  ;;  %v2101_v53 = vadd.f32 %v4122_v22, %v2085_v1  ;;  %v1816_v1 = vadd.f32 %v4091_v52, %v4083_v35 }
 0x2e2   : > { %v2113_v16 = vmax.f32 %v2101_v53, 0.0  ;;  %3178 = vmatmul.msk.bf16.vlgmr.msrb.gmra.mxu2 %vm2123_vm3, %v2184_v6  ;;  %3200 = vmatmul.msk.bf16.gmra.mxu3 %vm2123_vm3, %v2184_v6 }
 0x2e4   : > { %v2125_v44 = vsel %vm2123_vm3, %v2113_v16, 0.0  ;;  %v2150_v60 = vpack.c.bf16 %v2113_v16, %v2113_v16 }
 0x2e5   : > { %v2126_v27 = vadd.f32 %v2125_v44, %v2124_v24  ;;  %v2060_v29 = vpop.f32.mrf.mxu1 }
 0x2e6   : > { %v2000_v14 = vpop.f32.mrf.mxu0  ;;  %v2086_v30 = vadd.f32 %v2060_v29, %v2023_v34  ;;  %v2174_v51 = vunpack.c.l.b16 %v2150_v60  ;;  %v1901_v34 = vadd.f32 %v1881_v45, %v1816_v1  ;;  %v1947_v35 = vpop.f32.mrf.mxu3  ;;  %v1902_v60 = vadd.f32 %v1884_v23, %v4095_v9 }
 0x2e7   : > { %v2024_v42 = vadd.f32 %v2000_v14, %v1961_v26  ;;  %v1886_v36 = vpop.f32.mrf.mxu2 }
 0x2e8   : > { %v2102_v11 = vadd.f32 %v4122_v22, %v2086_v30  ;;  %v1965_v41 = vadd.f32 %v1947_v35, %v1902_v60 }
 0x2ea   : > { %v2114_v31 = vmax.f32 %v2102_v11, 0.0 }
 0x2ec   : > { %v2151_v47 = vpack.c.bf16 %v2114_v31, %v2114_v31  ;;  %v2136_v7 = vsel %vm2123_vm3, %v2114_v31, 0.0 }
 0x2ed   : > { %v2063_v58 = vpop.f32.mrf.mxu1  ;;  %v2137_v40 = vadd.f32 %v2136_v7, %v2135_v32 }
 0x2ee   : > { %v2175_v0 = vunpack.c.l.b16 %v2151_v47  ;;  %v2002_v38 = vpop.f32.mrf.mxu0  ;;  %v2087_v3 = vadd.f32 %v2063_v58, %v2024_v42  ;;  %v1821_v58 = vadd.f32 %v4101_v50, %v4093_v2 }
 0x2ef   : > { %v2025_v46 = vadd.f32 %v2002_v38, %v1962_v8  ;;  %v1889_v2 = vpop.f32.mrf.mxu2 }
 0x2f0   : > { %v2103_v10 = vadd.f32 %v4122_v22, %v2087_v3  ;;  %v2185_v39 = vpack.c.b16 %v2175_v0, %v2174_v51  ;;  %v1949_v3 = vpop.f32.mrf.mxu3 }
 0x2f2   : > { %v2115_v49 = vmax.f32 %v2103_v10, 0.0  ;;  %3179 = vmatmul.msk.bf16.gmra.mxu2 %vm2123_vm3, %v2185_v39  ;;  %3201 = vmatmul.msk.bf16.gmra.mxu3 %vm2123_vm3, %v2185_v39 }
 0x2f3   : > { %3229 = vmatmul.msk.bf16.vlgmr.msrb.gmra.mxu0 %vm2123_vm3, %v2185_v39 }
 0x2f4   : > { %v2127_v33 = vsel %vm2123_vm3, %v2115_v49, 0.0  ;;  %v2152_v43 = vpack.c.bf16 %v2115_v49, %v2115_v49  ;;  %v1903_v49 = vadd.f32 %v1886_v36, %v1821_v58 }
 0x2f5   : > { %v2128_v54 = vadd.f32 %v2127_v33, %v2126_v27  ;;  %v2065_v17 = vpop.f32.mrf.mxu1  ;;  %v1964_v27 = vadd.f32 %v1944_v62, %v1901_v34  ;;  %v1904_v62 = vadd.f32 %v1889_v2, %v4108_v18  ;;  %v4231_v2 = vld [vmem:[%s4343_s8] ss:$0 sm:$0xff] }
 0x2f6   : > { %v2005_v55 = vpop.f32.mrf.mxu0  ;;  %v2088_v57 = vadd.f32 %v2065_v17, %v2025_v46  ;;  %v2176_v16 = vunpack.c.l.b16 %v2152_v43 }
 0x2f7   : > { %v2026_v56 = vadd.f32 %v2005_v55, %v1963_v13 }
 0x2f8   : > { %v2104_v61 = vadd.f32 %v4122_v22, %v2088_v57  ;;  %v1952_v57 = vpop.f32.mrf.mxu3 }
 0x2f9   : > { %v1967_v32 = vadd.f32 %v1952_v57, %v1904_v62 }
 0x2fa   : > { %v2116_v25 = vmax.f32 %v2104_v61, 0.0 }
 0x2fc   : > { %v2138_v6 = vsel %vm2123_vm3, %v2116_v25, 0.0  ;;  %v2153_v53 = vpack.c.bf16 %v2116_v25, %v2116_v25 }
 0x2fd   : > { %v2139_v48 = vadd.f32 %v2138_v6, %v2137_v40  ;;  %v2068_v19 = vpop.f32.mrf.mxu1  ;;  %v1891_v6 = vpop.f32.mrf.mxu2 }
 0x2fe   : > { %v2177_v20 = vunpack.c.l.b16 %v2153_v53  ;;  %v2007_v15 = vpop.f32.mrf.mxu0  ;;  %v2089_v24 = vadd.f32 %v2068_v19, %v2026_v56  ;;  %v1826_v19 = vadd.f32 %v4115_v59, %v4106_v28  ;;  %v3423_v28 = vld [vmem:[%s4344_s9 + $0x18] sm:$0xff] }
 0x2ff   : > { %v2027_v52 = vadd.f32 %v2007_v15, %v1964_v27  ;;  %v3431_v59 = vld [vmem:[%s4344_s9 + $0x58] sm:$0xff]  ;;  %2610 = vmatpush.bf16.msra.mxu2 %v3423_v28 }
 0x300   : > { %v2105_v44 = vadd.f32 %v4122_v22, %v2089_v24  ;;  %v2186_v21 = vpack.c.b16 %v2177_v20, %v2176_v16  ;;  %v1954_v24 = vpop.f32.mrf.mxu3  ;;  %v1905_v18 = vadd.f32 %v1891_v6, %v1826_v19  ;;  %2660 = vmatpush.bf16.msra.mxu3 %v3431_v59  ;;  %v3432_v19 = vld [vmem:[%s4344_s9 + $0x60] sm:$0xff] }
 0x302   : > { %v2117_v29 = vmax.f32 %v2105_v44, 0.0  ;;  %3180 = vmatmul.msk.bf16.gmra.mxu2 %vm2123_vm3, %v2186_v21  ;;  %3202 = vmatmul.msk.bf16.gmra.mxu3 %vm2123_vm3, %v2186_v21  ;;  %v1968_v23 = vadd.f32 %v1954_v24, %v1905_v18  ;;  %v3439_v18 = vld [vmem:[%s4344_s9 + $0x98] sm:$0xff] }
 0x303   : > { %3230 = vmatmul.msk.bf16.gmra.mxu0 %vm2123_vm3, %v2186_v21 }
 0x304   : > { %v2129_v14 = vsel %vm2123_vm3, %v2117_v29, 0.0  ;;  %v2154_v42 = vpack.c.bf16 %v2117_v29, %v2117_v29  ;;  %v3427_v29 = vld [vmem:[%s4344_s9 + $0x38] sm:$0xff] }
 0x305   : > { %v2130_v30 = vadd.f32 %v2129_v14, %v2128_v54  ;;  %v2070_v5 = vpop.f32.mrf.mxu1  ;;  %v1966_v54 = vadd.f32 %v1949_v3, %v1903_v49  ;;  %2572 = vmatpush.bf16.msra.mxu1 %v3427_v29 }
 0x306   : > { %v2010_v11 = vpop.f32.mrf.mxu0  ;;  %v2090_v26 = vadd.f32 %v2070_v5, %v2027_v52  ;;  %v2178_v10 = vunpack.c.l.b16 %v2154_v42 }
 0x307   : > { %v2028_v51 = vadd.f32 %v2010_v11, %v1965_v41 }
 0x308   : > { %v2106_v31 = vadd.f32 %v4122_v22, %v2090_v26  ;;  %v2323_v3 = vpop.f32.mrf.mxu3 }
 0x30a   : > { %v2118_v47 = vmax.f32 %v2106_v31, 0.0 }
 0x30c   : > { %v2140_v0 = vsel %vm2123_vm3, %v2118_v47, 0.0  ;;  %v2155_v38 = vpack.c.bf16 %v2118_v47, %v2118_v47 }
 0x30d   : > { %v2141_v4 = vadd.f32 %v2140_v0, %v2139_v48  ;;  %v2073_v63 = vpop.f32.mrf.mxu1  ;;  %v3426_v0 = vld [vmem:[%s4344_s9 + $0x30] sm:$0xff] }
 0x30e   : > { %v2179_v39 = vunpack.c.l.b16 %v2155_v38  ;;  %v2012_v8 = vpop.f32.mrf.mxu0  ;;  %v2091_v9 = vadd.f32 %v2073_v63, %v2028_v51  ;;  %v3430_v51 = vld [vmem:[%s4344_s9 + $0x50] sm:$0xff]  ;;  %2573 = vmatpush.bf16.msra.mxu1 %v3426_v0  ;;  %v3421_v38 = vld [vmem:[%s4344_s9 + $0x8] sm:$0xff] }
 0x30f   : > { %v2029_v50 = vadd.f32 %v2012_v8, %v1966_v54  ;;  %2661 = vmatpush.bf16.msra.mxu3 %v3430_v51  ;;  %v3425_v63 = vld [vmem:[%s4344_s9 + $0x28] sm:$0xff] }
 0x310   : > { %v2107_v46 = vadd.f32 %v4122_v22, %v2091_v9  ;;  %v2187_v33 = vpack.c.b16 %v2179_v39, %v2178_v10  ;;  %v3424_v10 = vld [vmem:[%s4344_s9 + $0x20] sm:$0xff]  ;;  %v2325_v39 = vpop.f32.mrf.mxu3  ;;  %v3429_v9 = vld [vmem:[%s4344_s9 + $0x48] sm:$0xff] }
 0x312   : > { %v2119_v17 = vmax.f32 %v2107_v46, 0.0  ;;  %3181 = vmatmul.msk.bf16.gmra.mxu2 %vm2123_vm3, %v2187_v33  ;;  %3203 = vmatmul.msk.bf16.gmra.mxu3 %vm2123_vm3, %v2187_v33 }
 0x313   : > { %3231 = vmatmul.msk.bf16.gmra.mxu0 %vm2123_vm3, %v2187_v33  ;;  %2574 = vmatpush.bf16.msra.mxu1 %v3425_v63 }
 0x314   : > { %v2131_v55 = vsel %vm2123_vm3, %v2119_v17, 0.0  ;;  %v2156_v43 = vpack.c.bf16 %v2119_v17, %v2119_v17  ;;  %2662 = vmatpush.bf16.msra.mxu3 %v3429_v9 }
 0x315   : > { %v2132_v45 = vadd.f32 %v2131_v55, %v2130_v30  ;;  %v2075_v37 = vpop.f32.mrf.mxu1 }
 0x316   : > { %v2092_v7 = vadd.f32 %v2075_v37, %v2029_v50  ;;  %v2015_v61 = vpop.f32.mrf.mxu0  ;;  %v2180_v16 = vunpack.c.l.b16 %v2156_v43  ;;  %v3435_v50 = vld [vmem:[%s4344_s9 + $0x78] sm:$0xff]  ;;  %v3433_v43 = vld [vmem:[%s4344_s9 + $0x68] sm:$0xff] }
 0x317   : > { %v2030_v40 = vadd.f32 %v2015_v61, %v1967_v32  ;;  %2575 = vmatpush.bf16.msra.mxu1 %v3424_v10  ;;  %v3434_v61 = vld [vmem:[%s4344_s9 + $0x70] sm:$0xff] }
 0x318   : > { %v2108_v13 = vadd.f32 %v4122_v22, %v2092_v7 }
 0x31a   : > { %v2120_v25 = vmax.f32 %v2108_v13, 0.0 }
 0x31b   : > { %2712 = vmatpush.bf16.msrb.mxu1 %v3435_v50  ;;  %v3440_v50 = vld [vmem:[%s4344_s9 + $0xa0] sm:$0xff] }
 0x31c   : > { %v2142_v1 = vsel %vm2123_vm3, %v2120_v25, 0.0  ;;  %v2157_v56 = vpack.c.bf16 %v2120_v25, %v2120_v25 }
 0x31d   : > { %v2143_v53 = vadd.f32 %v2142_v1, %v2141_v4  ;;  %v2078_v48 = vpop.f32.mrf.mxu1  ;;  %v3420_v4 = vld [vmem:[%s4344_s9] sm:$0xff] }
 0x31e   : > { %v2181_v20 = vunpack.c.l.b16 %v2157_v56  ;;  %v2093_v15 = vadd.f32 %v2078_v48, %v2030_v40  ;;  %v2017_v21 = vpop.f32.mrf.mxu0 }
 0x31f   : > { %v2031_v35 = vadd.f32 %v2017_v21, %v1968_v23  ;;  %2713 = vmatpush.bf16.msrb.mxu1 %v3434_v61 }
 0x320   : > { %v2109_v34 = vadd.f32 %v4122_v22, %v2093_v15  ;;  %v2188_v44 = vpack.c.b16 %v2181_v20, %v2180_v16 }
 0x322   : > { %v2121_v27 = vmax.f32 %v2109_v34, 0.0  ;;  %3182 = vmatmul.msk.bf16.gmra.mxu2 %vm2123_vm3, %v2188_v44  ;;  %3204 = vmatmul.msk.bf16.gmra.mxu3 %vm2123_vm3, %v2188_v44 }
 0x323   : > { %3232 = vmatmul.msk.bf16.gmra.mxu0 %vm2123_vm3, %v2188_v44  ;;  %2714 = vmatpush.bf16.msrb.mxu1 %v3433_v43 }
 0x324   : > { %v2133_v52 = vsel %vm2123_vm3, %v2121_v27, 0.0  ;;  %v2158_v26 = vpack.c.bf16 %v2121_v27, %v2121_v27  ;;  %v3438_v27 = vld [vmem:[%s4344_s9 + $0x90] sm:$0xff] }
 0x325   : > { %v2134_v14 = vadd.f32 %v2133_v52, %v2132_v45  ;;  %v2080_v30 = vpop.f32.mrf.mxu1  ;;  %v3437_v52 = vld [vmem:[%s4344_s9 + $0x88] sm:$0xff] }
 0x326   : > { %v2094_v5 = vadd.f32 %v2080_v30, %v2031_v35  ;;  %v2182_v47 = vunpack.c.l.b16 %v2158_v26 }
 0x327   : > { %2146 = vst.msk [vmem:[%s4033_s26 + $0x8] sm:$0xff] %vm2123_vm3, %v2134_v14  ;;  %2715 = vmatpush.bf16.msrb.mxu1 %v3432_v19 }
 0x328   : > { %v2110_v11 = vadd.f32 %v4122_v22, %v2094_v5  ;;  %v3422_v22 = vld [vmem:[%s4344_s9 + $0x10] sm:$0xff] }
 0x329   : > { %2611 = vmatpush.bf16.msra.mxu2 %v3422_v22  ;;  %v3443_v22 = vld [vmem:[%s4344_s9 + $0xb8] sm:$0xff] }
 0x32a   : > { %v2122_v60 = vmax.f32 %v2110_v11, 0.0 }
 0x32c   : > { %v2144_v31 = vsel %vm2123_vm3, %v2122_v60, 0.0  ;;  %v2159_v41 = vpack.c.bf16 %v2122_v60, %v2122_v60 }
 0x32d   : > { %v2145_v42 = vadd.f32 %v2144_v31, %v2143_v53  ;;  %2612 = vmatpush.bf16.msra.mxu2 %v3421_v38  ;;  %v3436_v31 = vld [vmem:[%s4344_s9 + $0x80] sm:$0xff] }
 0x32e   : > { %v2183_v36 = vunpack.c.l.b16 %v2159_v41 }
 0x32f   : > { %2147 = vst.msk [vmem:[%s4033_s26 + $0x28] sm:$0xff] %vm2123_vm3, %v2145_v42 }
 0x330   : > { %v2189_v58 = vpack.c.b16 %v2183_v36, %v2182_v47 }
 0x331   : > { %2613 = vmatpush.bf16.msra.mxu2 %v3420_v4  ;;  %v3442_v4 = vld [vmem:[%s4344_s9 + $0xb0] sm:$0xff] }
 0x332   : > { %3183 = vmatmul.msk.bf16.gmra.mxu2 %vm2123_vm3, %v2189_v58 }
 0x333   : > { %3233 = vmatmul.msk.bf16.gmra.mxu0 %vm2123_vm3, %v2189_v58 }
 0x335   : > { %2764 = vmatpush.bf16.msrb.mxu2 %v3439_v18 }
 0x339   : > { %2765 = vmatpush.bf16.msrb.mxu2 %v3438_v27 }
 0x33d   : > { %2766 = vmatpush.bf16.msrb.mxu2 %v3437_v52 }
 0x341   : > { %2767 = vmatpush.bf16.msrb.mxu2 %v3436_v31 }
 0x342   : > { %2614 = vmatmul.bf16.vlgmr.msra.gmra.mxu2 %v3472_v12 }
 0x343   : > { %2419 = vmatmul.bf16.gmra.mxu0 %v3472_v12  ;;  %v3428_v12 = vld [vmem:[%s4344_s9 + $0x40] sm:$0xff] }
 0x344   : > { %2663 = vmatpush.bf16.msra.mxu3 %v3428_v12 }
 0x348   : > { %2816 = vmatpush.bf16.msrb.mxu3 %v3443_v22 }
 0x34c   : > { %2817 = vmatpush.bf16.msrb.mxu3 %v3442_v4 }
 0x365   : > { %v2258_v8 = vpop.f32.mrf.mxu2  ;;  %v2328_v49 = vpop.f32.mrf.mxu3 }
 0x366   : > { %v2324_v33 = vadd.f32 %v2323_v3, %v2258_v8  ;;  %v3441_v8 = vld [vmem:[%s4344_s9 + $0xa8] sm:$0xff] }
 0x367   : > { %2818 = vmatpush.bf16.msrb.mxu3 %v3441_v8 }
 0x36b   : > { %2819 = vmatpush.bf16.msrb.mxu3 %v3440_v50 }
 0x36d   : > { %v2260_v46 = vpop.f32.mrf.mxu2  ;;  %v2330_v45 = vpop.f32.mrf.mxu3 }
 0x36e   : > { %v2326_v37 = vadd.f32 %v2325_v39, %v2260_v46 }
 0x370   : > { %v2395_v54 = vpop.f32.mrf.mxu0 }
 0x371   : > { %v2425_v17 = vadd.f32 %v2395_v54, %v2324_v33 }
 0x373   : > { %v2441_v55 = vadd.f32 %v4231_v2, %v2425_v17 }
 0x375   : > { %v2263_v57 = vpop.f32.mrf.mxu2  ;;  %v4240_v62 = vmax.f32 %v2441_v55, 0.0  ;;  %v2333_v53 = vpop.f32.mrf.mxu3 }
 0x376   : > { %v2329_v56 = vadd.f32 %v2328_v49, %v2263_v57 }
 0x377   : > { %v2489_v25 = vpack.c.bf16 %v4240_v62, %v4240_v62 }
 0x378   : > { %v2397_v7 = vpop.f32.mrf.mxu0 }
 0x379   : > { %v2426_v13 = vadd.f32 %v2397_v7, %v2326_v37  ;;  %v2509_v16 = vunpack.c.l.b16 %v2489_v25 }
 0x37b   : > { %v2442_v32 = vadd.f32 %v4231_v2, %v2426_v13 }
 0x37d   : > { %v4248_v40 = vmax.f32 %v2442_v32, 0.0  ;;  %v2265_v1 = vpop.f32.mrf.mxu2  ;;  %v2335_v29 = vpop.f32.mrf.mxu3 }
 0x37e   : > { %v2331_v21 = vadd.f32 %v2330_v45, %v2265_v1 }
 0x37f   : > { %v2490_v6 = vpack.c.bf16 %v4248_v40, %v4248_v40 }
 0x380   : > { %v2400_v48 = vpop.f32.mrf.mxu0 }
 0x381   : > { %v2510_v20 = vunpack.c.l.b16 %v2490_v6  ;;  %v2427_v15 = vadd.f32 %v2400_v48, %v2329_v56 }
 0x383   : > { %v2519_v24 = vpack.c.b16 %v2510_v20, %v2509_v16  ;;  %v2443_v34 = vadd.f32 %v4231_v2, %v2427_v15 }
 0x385   : > { %3258 = vmatmul.msk.bf16.vlgmr.msra.gmra.mxu1 %vm2123_vm3, %v2519_v24  ;;  %v2268_v44 = vpop.f32.mrf.mxu2  ;;  %v4263_v28 = vmax.f32 %v2443_v34, 0.0  ;;  %v2338_v58 = vpop.f32.mrf.mxu3 }
 0x386   : > { %v2334_v11 = vadd.f32 %v2333_v53, %v2268_v44 }
 0x387   : > { %v2491_v14 = vpack.c.bf16 %v4263_v28, %v4263_v28 }
 0x388   : > { %v2402_v23 = vpop.f32.mrf.mxu0 }
 0x389   : > { %v2428_v59 = vadd.f32 %v2402_v23, %v2331_v21  ;;  %v2511_v41 = vunpack.c.l.b16 %v2491_v14 }
 0x38b   : > { %v2444_v35 = vadd.f32 %v4231_v2, %v2428_v59 }
 0x38d   : > { %v4271_v30 = vmax.f32 %v2444_v35, 0.0  ;;  %v2270_v5 = vpop.f32.mrf.mxu2  ;;  %v2340_v33 = vpop.f32.mrf.mxu3 }
 0x38e   : > { %v2336_v38 = vadd.f32 %v2335_v29, %v2270_v5  ;;  %v2466_v5 = vsel %vm2123_vm3, %v4263_v28, 0.0 }
 0x38f   : > { %v2492_v26 = vpack.c.bf16 %v4271_v30, %v4271_v30 }
 0x390   : > { %v2405_v60 = vpop.f32.mrf.mxu0 }
 0x391   : > { %v2512_v42 = vunpack.c.l.b16 %v2492_v26  ;;  %v2429_v47 = vadd.f32 %v2405_v60, %v2334_v11  ;;  %v2465_v60 = vsel %vm2123_vm3, %v4240_v62, 0.0  ;;  %v2477_v62 = vsel %vm2123_vm3, %v4271_v30, 0.0 }
 0x393   : > { %v2520_v36 = vpack.c.b16 %v2512_v42, %v2511_v41  ;;  %v2445_v51 = vadd.f32 %v4231_v2, %v2429_v47  ;;  %v2467_v47 = vadd.f32 %v2466_v5, %v2465_v60 }
 0x395   : > { %3299 = vmatmul.msk.bf16.vlgmr.msra.gmra.mxu3 %vm2123_vm3, %v2520_v36  ;;  %v2273_v0 = vpop.f32.mrf.mxu2  ;;  %v2457_v63 = vmax.f32 %v2445_v51, 0.0  ;;  %v2343_v32 = vpop.f32.mrf.mxu3 }
 0x396   : > { %v2339_v54 = vadd.f32 %v2338_v58, %v2273_v0 }
 0x397   : > { %v2493_v9 = vpack.c.bf16 %v2457_v63, %v2457_v63  ;;  %v2468_v31 = vsel %vm2123_vm3, %v2457_v63, 0.0 }
 0x398   : > { %v2407_v3 = vpop.f32.mrf.mxu0 }
 0x399   : > { %v2430_v10 = vadd.f32 %v2407_v3, %v2336_v38  ;;  %v2513_v55 = vunpack.c.l.b16 %v2493_v9  ;;  %v2469_v38 = vadd.f32 %v2468_v31, %v2467_v47 }
 0x39b   : > { %v2446_v39 = vadd.f32 %v4231_v2, %v2430_v10 }
 0x39d   : > { %v4290_v49 = vmax.f32 %v2446_v39, 0.0  ;;  %v2275_v46 = vpop.f32.mrf.mxu2  ;;  %v2345_v34 = vpop.f32.mrf.mxu3 }
 0x39e   : > { %v2341_v13 = vadd.f32 %v2340_v33, %v2275_v46  ;;  %v2476_v46 = vsel %vm2123_vm3, %v4248_v40, 0.0 }
 0x39f   : > { %v2494_v12 = vpack.c.bf16 %v4290_v49, %v4290_v49  ;;  %v2479_v33 = vsel %vm2123_vm3, %v4290_v49, 0.0 }
 0x3a0   : > { %v2410_v17 = vpop.f32.mrf.mxu0 }
 0x3a1   : > { %v2514_v57 = vunpack.c.l.b16 %v2494_v12  ;;  %v2431_v45 = vadd.f32 %v2410_v17, %v2339_v54  ;;  %v2478_v17 = vadd.f32 %v2477_v62, %v2476_v46 }
 0x3a3   : > { %v2521_v37 = vpack.c.b16 %v2514_v57, %v2513_v55  ;;  %v2447_v7 = vadd.f32 %v4231_v2, %v2431_v45  ;;  %v2480_v45 = vadd.f32 %v2479_v33, %v2478_v17 }
 0x3a5   : > { %3324 = vmatmul.msk.bf16.vlgmr.msrb.gmra.mxu1 %vm2123_vm3, %v2521_v37  ;;  %v2278_v61 = vpop.f32.mrf.mxu2  ;;  %v2459_v25 = vmax.f32 %v2447_v7, 0.0  ;;  %v2348_v14 = vpop.f32.mrf.mxu3 }
 0x3a6   : > { %v2344_v48 = vadd.f32 %v2343_v32, %v2278_v61 }
 0x3a7   : > { %v2495_v6 = vpack.c.bf16 %v2459_v25, %v2459_v25  ;;  %v2470_v58 = vsel %vm2123_vm3, %v2459_v25, 0.0 }
 0x3a8   : > { %v2412_v43 = vpop.f32.mrf.mxu0  ;;  %v2471_v10 = vadd.f32 %v2470_v58, %v2469_v38 }
 0x3a9   : > { %v2432_v1 = vadd.f32 %v2412_v43, %v2341_v13  ;;  %v2515_v15 = vunpack.c.l.b16 %v2495_v6 }
 0x3ab   : > { %v2448_v56 = vadd.f32 %v4231_v2, %v2432_v1 }
 0x3ad   : > { %v2460_v53 = vmax.f32 %v2448_v56, 0.0  ;;  %v2280_v16 = vpop.f32.mrf.mxu2  ;;  %v2350_v8 = vpop.f32.mrf.mxu3 }
 0x3ae   : > { %v2346_v23 = vadd.f32 %v2345_v34, %v2280_v16 }
 0x3af   : > { %v2496_v19 = vpack.c.bf16 %v2460_v53, %v2460_v53  ;;  %v2481_v30 = vsel %vm2123_vm3, %v2460_v53, 0.0 }
 0x3b0   : > { %v2415_v20 = vpop.f32.mrf.mxu0  ;;  %v2482_v7 = vadd.f32 %v2481_v30, %v2480_v45 }
 0x3b1   : > { %v2516_v24 = vunpack.c.l.b16 %v2496_v19  ;;  %v2433_v18 = vadd.f32 %v2415_v20, %v2344_v48 }
 0x3b3   : > { %v2522_v44 = vpack.c.b16 %v2516_v24, %v2515_v15  ;;  %v2449_v21 = vadd.f32 %v4231_v2, %v2433_v18  ;;  %v3461_v24 = vld [vmem:[%s4345_s10] ss:$0 sm:$0xff] }
 0x3b5   : > { %3349 = vmatmul.msk.bf16.vlgmr.msrb.gmra.mxu2 %vm2123_vm3, %v2522_v44  ;;  %v2461_v59 = vmax.f32 %v2449_v21, 0.0  ;;  %v2283_v35 = vpop.f32.mrf.mxu2 }
 0x3b6   : > { %v2349_v41 = vadd.f32 %v2348_v14, %v2283_v35 }
 0x3b7   : > { %v2497_v11 = vpack.c.bf16 %v2461_v59, %v2461_v59  ;;  %v2472_v3 = vsel %vm2123_vm3, %v2461_v59, 0.0 }
 0x3b8   : > { %v2417_v27 = vpop.f32.mrf.mxu0  ;;  %v2473_v9 = vadd.f32 %v2472_v3, %v2471_v10 }
 0x3b9   : > { %v2434_v29 = vadd.f32 %v2417_v27, %v2346_v23  ;;  %v2517_v22 = vunpack.c.l.b16 %v2497_v11 }
 0x3bb   : > { %v2450_v52 = vadd.f32 %v4231_v2, %v2434_v29 }
 0x3bd   : > { %v2462_v26 = vmax.f32 %v2450_v52, 0.0  ;;  %v2285_v39 = vpop.f32.mrf.mxu2 }
 0x3be   : > { %v2351_v54 = vadd.f32 %v2350_v8, %v2285_v39 }
 0x3bf   : > { %v2498_v42 = vpack.c.bf16 %v2462_v26, %v2462_v26  ;;  %v2483_v37 = vsel %vm2123_vm3, %v2462_v26, 0.0 }
 0x3c0   : > { %v2420_v36 = vpop.f32.mrf.mxu0  ;;  %v2484_v49 = vadd.f32 %v2483_v37, %v2482_v7 }
 0x3c1   : > { %v2518_v51 = vunpack.c.l.b16 %v2498_v42  ;;  %v2435_v0 = vadd.f32 %v2420_v36, %v2349_v41 }
 0x3c3   : > { %v2523_v28 = vpack.c.b16 %v2518_v51, %v2517_v22  ;;  %v2451_v4 = vadd.f32 %v4231_v2, %v2435_v0 }
 0x3c5   : > { %v2463_v63 = vmax.f32 %v2451_v4, 0.0  ;;  %3374 = vmatmul.msk.bf16.vlgmr.msrb.gmra.mxu3 %vm2123_vm3, %v2523_v28  ;;  %v2615_v25 = vpop.f32.mrf.mxu2 }
 0x3c7   : > { %v2474_v12 = vsel %vm2123_vm3, %v2463_v63, 0.0 }
 0x3c8   : > { %v2475_v50 = vadd.f32 %v2474_v12, %v2473_v9  ;;  %v2422_v55 = vpop.f32.mrf.mxu0 }
 0x3c9   : > { %v2436_v57 = vadd.f32 %v2422_v55, %v2351_v54 }
 0x3ca   : > { %2487 = vst.msk [vmem:[%s4033_s26 + $0x10] sm:$0xff] %vm2123_vm3, %v2475_v50 }
 0x3cb   : > { %v2452_v40 = vadd.f32 %v4231_v2, %v2436_v57 }
 0x3cd   : > { %v2464_v61 = vmax.f32 %v2452_v40, 0.0  ;;  %v2617_v6 = vpop.f32.mrf.mxu2 }
 0x3cf   : > { %v2485_v13 = vsel %vm2123_vm3, %v2464_v61, 0.0 }
 0x3d0   : > { %v2486_v32 = vadd.f32 %v2485_v13, %v2484_v49 }
 0x3d2   : > { %2488 = vst.msk [vmem:[%s4033_s26 + $0x30] sm:$0xff] %vm2123_vm3, %v2486_v32 }
 0x402   : > { %v2577_v43 = vpop.f32.mrf.mxu1 }
 0x403   : > { %v2616_v19 = vadd.f32 %v2615_v25, %v2577_v43 }
 0x40a   : > { %v2579_v56 = vpop.f32.mrf.mxu1 }
 0x40b   : > { %v2618_v34 = vadd.f32 %v2617_v6, %v2579_v56 }
 0x418   : > { %v2665_v1 = vpop.f32.mrf.mxu3 }
 0x419   : > { %v2670_v20 = vadd.f32 %v2665_v1, %v2616_v19 }
 0x420   : > { %v2667_v53 = vpop.f32.mrf.mxu3 }
 0x421   : > { %v2671_v23 = vadd.f32 %v2667_v53, %v2618_v34 }
 0x422   : > { %v2717_v48 = vpop.f32.mrf.mxu1 }
 0x423   : > { %v2722_v2 = vadd.f32 %v2717_v48, %v2670_v20 }
 0x42a   : > { %v2719_v21 = vpop.f32.mrf.mxu1 }
 0x42b   : > { %v2723_v29 = vadd.f32 %v2719_v21, %v2671_v23 }
 0x438   : > { %v2769_v16 = vpop.f32.mrf.mxu2 }
 0x439   : > { %v2774_v15 = vadd.f32 %v2769_v16, %v2722_v2 }
 0x440   : > { %v2771_v59 = vpop.f32.mrf.mxu2 }
 0x441   : > { %v2775_v52 = vadd.f32 %v2771_v59, %v2723_v29 }
 0x448   : > { %v2821_v18 = vpop.f32.mrf.mxu3 }
 0x449   : > { %v2826_v44 = vadd.f32 %v2821_v18, %v2774_v15 }
 0x44b   : > { %v2832_v27 = vadd.f32 %v3461_v24, %v2826_v44 }
 0x44d   : > { %v2834_v35 = vmax.f32 %v2832_v27, 0.0 }
 0x44f   : > { %2838 = vst [vmem:[%s4033_s26 + $0x18] sm:$0xff] %v2834_v35 }
 0x450   : > { %v2823_v14 = vpop.f32.mrf.mxu3 }
 0x451   : > { %v2827_v5 = vadd.f32 %v2823_v14, %v2775_v52 }
 0x453   : > { %v2833_v11 = vadd.f32 %v3461_v24, %v2827_v5 }
 0x455   : > { %v2835_v26 = vmax.f32 %v2833_v11, 0.0 }
 0x457   : > { %2839 = vst [vmem:[%s4033_s26 + $0x38] sm:$0xff] %v2835_v26 }
 0x458 PF: > { %s21_s17 = sadd.s32 1, %s3470_s17  }
 0x459   : > { %p18_p4 = scmp.ge.s32.totalorder %s21_s17, 4  }
 0x45b   :  { %20 = sbr.rel (!%p18_p4) target bundleno = 1 (0x1), region = 108 }

</bundles_post_ra>
